<compile_context>
chip_gen: v6e
topology: v6e:2x2x1
jax: 0.10.0
libtpu: 0.0.40
codegen_flags: <defaults>
</compile_context>

<pallas_src>
import functools

import numpy as np
import jax
import jax.numpy as jnp
from jax.experimental import pallas as pl
from jax.experimental.pallas import tpu as pltpu


def _convt_sigmoid_kernel(w_ref, b_ref, x_ref, o_ref, *, cin, cout, k, hout, wout):
    # w_ref: SMEM (cin*cout*k*k,) f32 -- PyTorch ConvTranspose2d (Cin, Cout, K, K) layout, flat.
    # b_ref: SMEM (cout,) f32
    # x_ref: VMEM (cin, Hp, Wp) f32  -- one zero-padded sample (Hp = H + 2*(K-1))
    # o_ref: VMEM (cout, hout, wout) f32
    x = x_ref[...]                                        # (cin, Hp, Wp): a few vregs, loaded once
    for o in range(cout):
        # bias folded into the accumulator init (no separate bias input / broadcast add)
        acc = jnp.full((hout, wout), b_ref[o], dtype=jnp.float32)
        for ci in range(cin):
            xc = x[ci]                                    # (Hp, Wp)
            for kh in range(k):
                for kw in range(k):
                    # transposed conv (stride 1, pad 0) == full correlation with a
                    # spatially flipped kernel -> read the flipped weight scalar.
                    widx = ((ci * cout + o) * k + (k - 1 - kh)) * k + (k - 1 - kw)
                    acc = acc + w_ref[widx] * xc[kh:kh + hout, kw:kw + wout]
        o_ref[o] = jax.nn.sigmoid(acc)


@jax.jit
def conv_transpose_sigmoid(x, w, b):
    """x: (N, Cin, H, W) f32; w: (Cin, Cout, K, K) f32 (PyTorch ConvTranspose2d layout);
    b: (Cout,) f32.  Returns sigmoid(conv_transpose2d(x, w, b)) as (N, Cout, H+K-1, W+K-1)."""
    N, Cin, H, W = x.shape
    Cin_w, Cout, K, K2 = w.shape
    assert Cin_w == Cin and K == K2
    Hout, Wout = H + K - 1, W + K - 1
    Hp, Wp = H + 2 * (K - 1), W + 2 * (K - 1)

    xpad = jnp.pad(x.astype(jnp.float32),
                   ((0, 0), (0, 0), (K - 1, K - 1), (K - 1, K - 1)))   # (N, Cin, Hp, Wp)
    wflat = w.astype(jnp.float32).reshape(-1)                          # (Cin*Cout*K*K,)
    bvec = b.astype(jnp.float32)                                       # (Cout,)

    kernel = functools.partial(_convt_sigmoid_kernel,
                               cin=Cin, cout=Cout, k=K, hout=Hout, wout=Wout)

    return pl.pallas_call(
        kernel,
        out_shape=jax.ShapeDtypeStruct((N, Cout, Hout, Wout), jnp.float32),
        grid=(N,),
        in_specs=[
            pl.BlockSpec(memory_space=pltpu.MemorySpace.SMEM),          # weight scalars
            pl.BlockSpec(memory_space=pltpu.MemorySpace.SMEM),          # bias scalars
            pl.BlockSpec((None, Cin, Hp, Wp), lambda n: (n, 0, 0, 0)),  # one padded sample
        ],
        out_specs=pl.BlockSpec((None, Cout, Hout, Wout), lambda n: (n, 0, 0, 0)),
        compiler_params=pltpu.CompilerParams(dimension_semantics=("parallel",)),
    )(wflat, bvec, xpad)


def _reference_np(x, w, b):
    x, w, b = np.asarray(x), np.asarray(w), np.asarray(b)
    N, Cin, H, W = x.shape
    _, Cout, K, _ = w.shape
    Hout, Wout = H + K - 1, W + K - 1
    y = np.zeros((N, Cout, Hout, Wout), np.float32)
    for n in range(N):
        for ci in range(Cin):
            for o in range(Cout):
                for i in range(H):
                    for j in range(W):
                        y[n, o, i:i + K, j:j + K] += x[n, ci, i, j] * w[ci, o]
    y += b.reshape(1, Cout, 1, 1)
    return 1.0 / (1.0 + np.exp(-y))


if __name__ == "__main__":
    key = jax.random.PRNGKey(0)
    kx, kw, kb = jax.random.split(key, 3)

    Cin, Cout, K = 3, 3, 3
    x = jax.random.normal(kx, (1, Cin, 3, 3), dtype=jnp.float32)            # matches x1 in source
    w = jax.random.normal(kw, (Cin, Cout, K, K), dtype=jnp.float32) * 0.1   # ConvTranspose2d weight
    b = jax.random.normal(kb, (Cout,), dtype=jnp.float32) * 0.1             # ConvTranspose2d bias

    out = jax.block_until_ready(conv_transpose_sigmoid(x, w, b))
    ref = _reference_np(x, w, b)

    assert out.shape == (1, Cout, 5, 5), out.shape
    np.testing.assert_allclose(np.asarray(out), ref, rtol=1e-5, atol=1e-5)
    print("KERNEL_OK")
</pallas_src>

<mosaic_0001>
module attributes {stable_mosaic.version = 11 : i64} {
  func.func @_convt_sigmoid_kernel(%arg0: i32, %arg1: memref<81xf32, #tpu.memory_space<smem>>, %arg2: memref<3xf32, #tpu.memory_space<smem>>, %arg3: memref<1x3x7x7xf32, #tpu.memory_space<vmem>>, %arg4: memref<1x3x5x5xf32, #tpu.memory_space<vmem>>) attributes {dimension_semantics = [#tpu.dimension_semantics<parallel>], iteration_bounds = array<i64: 1>, scalar_prefetch = 0 : i64, scratch_operands = 0 : i64, tpu.core_type = #tpu.core_type<tc>, window_params = [{transform_indices = @transform_0, window_bounds = array<i64: 81>}, {transform_indices = @transform_1, window_bounds = array<i64: 3>}, {transform_indices = @transform_2, window_bounds = array<i64: 1, 3, 7, 7>}, {transform_indices = @transform_3, window_bounds = array<i64: 1, 3, 5, 5>}]} {
    %c0 = arith.constant 0 : index
    %c0_0 = arith.constant 0 : index
    %c0_1 = arith.constant 0 : index
    %c0_2 = arith.constant 0 : index
    %0 = vector.load %arg3[%c0, %c0_0, %c0_1, %c0_2] : memref<1x3x7x7xf32, #tpu.memory_space<vmem>>, vector<1x3x7x7xf32>
    %1 = vector.shape_cast %0 : vector<1x3x7x7xf32> to vector<3x7x7xf32>
    %c0_3 = arith.constant 0 : index
    %2 = memref.load %arg2[%c0_3] : memref<3xf32, #tpu.memory_space<smem>>
    %3 = vector.broadcast %2 : f32 to vector<5x5xf32>
    %4 = vector.extract_strided_slice %1 {offsets = [0, 0, 0], sizes = [1, 7, 7], strides = [1, 1, 1]} : vector<3x7x7xf32> to vector<1x7x7xf32>
    %5 = vector.shape_cast %4 : vector<1x7x7xf32> to vector<7x7xf32>
    %c8 = arith.constant 8 : index
    %6 = memref.load %arg1[%c8] : memref<81xf32, #tpu.memory_space<smem>>
    %7 = vector.extract_strided_slice %5 {offsets = [0, 0], sizes = [5, 5], strides = [1, 1]} : vector<7x7xf32> to vector<5x5xf32>
    %8 = vector.broadcast %6 : f32 to vector<5x5xf32>
    %9 = arith.mulf %8, %7 : vector<5x5xf32>
    %10 = arith.addf %3, %9 : vector<5x5xf32>
    %c7 = arith.constant 7 : index
    %11 = memref.load %arg1[%c7] : memref<81xf32, #tpu.memory_space<smem>>
    %12 = vector.extract_strided_slice %5 {offsets = [0, 1], sizes = [5, 5], strides = [1, 1]} : vector<7x7xf32> to vector<5x5xf32>
    %13 = vector.broadcast %11 : f32 to vector<5x5xf32>
    %14 = arith.mulf %13, %12 : vector<5x5xf32>
    %15 = arith.addf %10, %14 : vector<5x5xf32>
    %c6 = arith.constant 6 : index
    %16 = memref.load %arg1[%c6] : memref<81xf32, #tpu.memory_space<smem>>
    %17 = vector.extract_strided_slice %5 {offsets = [0, 2], sizes = [5, 5], strides = [1, 1]} : vector<7x7xf32> to vector<5x5xf32>
    %18 = vector.broadcast %16 : f32 to vector<5x5xf32>
    %19 = arith.mulf %18, %17 : vector<5x5xf32>
    %20 = arith.addf %15, %19 : vector<5x5xf32>
    %c5 = arith.constant 5 : index
    %21 = memref.load %arg1[%c5] : memref<81xf32, #tpu.memory_space<smem>>
    %22 = vector.extract_strided_slice %5 {offsets = [1, 0], sizes = [5, 5], strides = [1, 1]} : vector<7x7xf32> to vector<5x5xf32>
    %23 = vector.broadcast %21 : f32 to vector<5x5xf32>
    %24 = arith.mulf %23, %22 : vector<5x5xf32>
    %25 = arith.addf %20, %24 : vector<5x5xf32>
    %c4 = arith.constant 4 : index
    %26 = memref.load %arg1[%c4] : memref<81xf32, #tpu.memory_space<smem>>
    %27 = vector.extract_strided_slice %5 {offsets = [1, 1], sizes = [5, 5], strides = [1, 1]} : vector<7x7xf32> to vector<5x5xf32>
    %28 = vector.broadcast %26 : f32 to vector<5x5xf32>
    %29 = arith.mulf %28, %27 : vector<5x5xf32>
    %30 = arith.addf %25, %29 : vector<5x5xf32>
    %c3 = arith.constant 3 : index
    %31 = memref.load %arg1[%c3] : memref<81xf32, #tpu.memory_space<smem>>
    %32 = vector.extract_strided_slice %5 {offsets = [1, 2], sizes = [5, 5], strides = [1, 1]} : vector<7x7xf32> to vector<5x5xf32>
    %33 = vector.broadcast %31 : f32 to vector<5x5xf32>
    %34 = arith.mulf %33, %32 : vector<5x5xf32>
    %35 = arith.addf %30, %34 : vector<5x5xf32>
    %c2 = arith.constant 2 : index
    %36 = memref.load %arg1[%c2] : memref<81xf32, #tpu.memory_space<smem>>
    %37 = vector.extract_strided_slice %5 {offsets = [2, 0], sizes = [5, 5], strides = [1, 1]} : vector<7x7xf32> to vector<5x5xf32>
    %38 = vector.broadcast %36 : f32 to vector<5x5xf32>
    %39 = arith.mulf %38, %37 : vector<5x5xf32>
    %40 = arith.addf %35, %39 : vector<5x5xf32>
    %c1 = arith.constant 1 : index
    %41 = memref.load %arg1[%c1] : memref<81xf32, #tpu.memory_space<smem>>
    %42 = vector.extract_strided_slice %5 {offsets = [2, 1], sizes = [5, 5], strides = [1, 1]} : vector<7x7xf32> to vector<5x5xf32>
    %43 = vector.broadcast %41 : f32 to vector<5x5xf32>
    %44 = arith.mulf %43, %42 : vector<5x5xf32>
    %45 = arith.addf %40, %44 : vector<5x5xf32>
    %c0_4 = arith.constant 0 : index
    %46 = memref.load %arg1[%c0_4] : memref<81xf32, #tpu.memory_space<smem>>
    %47 = vector.extract_strided_slice %5 {offsets = [2, 2], sizes = [5, 5], strides = [1, 1]} : vector<7x7xf32> to vector<5x5xf32>
    %48 = vector.broadcast %46 : f32 to vector<5x5xf32>
    %49 = arith.mulf %48, %47 : vector<5x5xf32>
    %50 = arith.addf %45, %49 : vector<5x5xf32>
    %51 = vector.extract_strided_slice %1 {offsets = [1, 0, 0], sizes = [1, 7, 7], strides = [1, 1, 1]} : vector<3x7x7xf32> to vector<1x7x7xf32>
    %52 = vector.shape_cast %51 : vector<1x7x7xf32> to vector<7x7xf32>
    %c35 = arith.constant 35 : index
    %53 = memref.load %arg1[%c35] : memref<81xf32, #tpu.memory_space<smem>>
    %54 = vector.extract_strided_slice %52 {offsets = [0, 0], sizes = [5, 5], strides = [1, 1]} : vector<7x7xf32> to vector<5x5xf32>
    %55 = vector.broadcast %53 : f32 to vector<5x5xf32>
    %56 = arith.mulf %55, %54 : vector<5x5xf32>
    %57 = arith.addf %50, %56 : vector<5x5xf32>
    %c34 = arith.constant 34 : index
    %58 = memref.load %arg1[%c34] : memref<81xf32, #tpu.memory_space<smem>>
    %59 = vector.extract_strided_slice %52 {offsets = [0, 1], sizes = [5, 5], strides = [1, 1]} : vector<7x7xf32> to vector<5x5xf32>
    %60 = vector.broadcast %58 : f32 to vector<5x5xf32>
    %61 = arith.mulf %60, %59 : vector<5x5xf32>
    %62 = arith.addf %57, %61 : vector<5x5xf32>
    %c33 = arith.constant 33 : index
    %63 = memref.load %arg1[%c33] : memref<81xf32, #tpu.memory_space<smem>>
    %64 = vector.extract_strided_slice %52 {offsets = [0, 2], sizes = [5, 5], strides = [1, 1]} : vector<7x7xf32> to vector<5x5xf32>
    %65 = vector.broadcast %63 : f32 to vector<5x5xf32>
    %66 = arith.mulf %65, %64 : vector<5x5xf32>
    %67 = arith.addf %62, %66 : vector<5x5xf32>
    %c32 = arith.constant 32 : index
    %68 = memref.load %arg1[%c32] : memref<81xf32, #tpu.memory_space<smem>>
    %69 = vector.extract_strided_slice %52 {offsets = [1, 0], sizes = [5, 5], strides = [1, 1]} : vector<7x7xf32> to vector<5x5xf32>
    %70 = vector.broadcast %68 : f32 to vector<5x5xf32>
    %71 = arith.mulf %70, %69 : vector<5x5xf32>
    %72 = arith.addf %67, %71 : vector<5x5xf32>
    %c31 = arith.constant 31 : index
    %73 = memref.load %arg1[%c31] : memref<81xf32, #tpu.memory_space<smem>>
    %74 = vector.extract_strided_slice %52 {offsets = [1, 1], sizes = [5, 5], strides = [1, 1]} : vector<7x7xf32> to vector<5x5xf32>
    %75 = vector.broadcast %73 : f32 to vector<5x5xf32>
    %76 = arith.mulf %75, %74 : vector<5x5xf32>
    %77 = arith.addf %72, %76 : vector<5x5xf32>
    %c30 = arith.constant 30 : index
    %78 = memref.load %arg1[%c30] : memref<81xf32, #tpu.memory_space<smem>>
    %79 = vector.extract_strided_slice %52 {offsets = [1, 2], sizes = [5, 5], strides = [1, 1]} : vector<7x7xf32> to vector<5x5xf32>
    %80 = vector.broadcast %78 : f32 to vector<5x5xf32>
    %81 = arith.mulf %80, %79 : vector<5x5xf32>
    %82 = arith.addf %77, %81 : vector<5x5xf32>
    %c29 = arith.constant 29 : index
    %83 = memref.load %arg1[%c29] : memref<81xf32, #tpu.memory_space<smem>>
    %84 = vector.extract_strided_slice %52 {offsets = [2, 0], sizes = [5, 5], strides = [1, 1]} : vector<7x7xf32> to vector<5x5xf32>
    %85 = vector.broadcast %83 : f32 to vector<5x5xf32>
    %86 = arith.mulf %85, %84 : vector<5x5xf32>
    %87 = arith.addf %82, %86 : vector<5x5xf32>
    %c28 = arith.constant 28 : index
    %88 = memref.load %arg1[%c28] : memref<81xf32, #tpu.memory_space<smem>>
    %89 = vector.extract_strided_slice %52 {offsets = [2, 1], sizes = [5, 5], strides = [1, 1]} : vector<7x7xf32> to vector<5x5xf32>
    %90 = vector.broadcast %88 : f32 to vector<5x5xf32>
    %91 = arith.mulf %90, %89 : vector<5x5xf32>
    %92 = arith.addf %87, %91 : vector<5x5xf32>
    %c27 = arith.constant 27 : index
    %93 = memref.load %arg1[%c27] : memref<81xf32, #tpu.memory_space<smem>>
    %94 = vector.extract_strided_slice %52 {offsets = [2, 2], sizes = [5, 5], strides = [1, 1]} : vector<7x7xf32> to vector<5x5xf32>
    %95 = vector.broadcast %93 : f32 to vector<5x5xf32>
    %96 = arith.mulf %95, %94 : vector<5x5xf32>
    %97 = arith.addf %92, %96 : vector<5x5xf32>
    %98 = vector.extract_strided_slice %1 {offsets = [2, 0, 0], sizes = [1, 7, 7], strides = [1, 1, 1]} : vector<3x7x7xf32> to vector<1x7x7xf32>
    %99 = vector.shape_cast %98 : vector<1x7x7xf32> to vector<7x7xf32>
    %c62 = arith.constant 62 : index
    %100 = memref.load %arg1[%c62] : memref<81xf32, #tpu.memory_space<smem>>
    %101 = vector.extract_strided_slice %99 {offsets = [0, 0], sizes = [5, 5], strides = [1, 1]} : vector<7x7xf32> to vector<5x5xf32>
    %102 = vector.broadcast %100 : f32 to vector<5x5xf32>
    %103 = arith.mulf %102, %101 : vector<5x5xf32>
    %104 = arith.addf %97, %103 : vector<5x5xf32>
    %c61 = arith.constant 61 : index
    %105 = memref.load %arg1[%c61] : memref<81xf32, #tpu.memory_space<smem>>
    %106 = vector.extract_strided_slice %99 {offsets = [0, 1], sizes = [5, 5], strides = [1, 1]} : vector<7x7xf32> to vector<5x5xf32>
    %107 = vector.broadcast %105 : f32 to vector<5x5xf32>
    %108 = arith.mulf %107, %106 : vector<5x5xf32>
    %109 = arith.addf %104, %108 : vector<5x5xf32>
    %c60 = arith.constant 60 : index
    %110 = memref.load %arg1[%c60] : memref<81xf32, #tpu.memory_space<smem>>
    %111 = vector.extract_strided_slice %99 {offsets = [0, 2], sizes = [5, 5], strides = [1, 1]} : vector<7x7xf32> to vector<5x5xf32>
    %112 = vector.broadcast %110 : f32 to vector<5x5xf32>
    %113 = arith.mulf %112, %111 : vector<5x5xf32>
    %114 = arith.addf %109, %113 : vector<5x5xf32>
    %c59 = arith.constant 59 : index
    %115 = memref.load %arg1[%c59] : memref<81xf32, #tpu.memory_space<smem>>
    %116 = vector.extract_strided_slice %99 {offsets = [1, 0], sizes = [5, 5], strides = [1, 1]} : vector<7x7xf32> to vector<5x5xf32>
    %117 = vector.broadcast %115 : f32 to vector<5x5xf32>
    %118 = arith.mulf %117, %116 : vector<5x5xf32>
    %119 = arith.addf %114, %118 : vector<5x5xf32>
    %c58 = arith.constant 58 : index
    %120 = memref.load %arg1[%c58] : memref<81xf32, #tpu.memory_space<smem>>
    %121 = vector.extract_strided_slice %99 {offsets = [1, 1], sizes = [5, 5], strides = [1, 1]} : vector<7x7xf32> to vector<5x5xf32>
    %122 = vector.broadcast %120 : f32 to vector<5x5xf32>
    %123 = arith.mulf %122, %121 : vector<5x5xf32>
    %124 = arith.addf %119, %123 : vector<5x5xf32>
    %c57 = arith.constant 57 : index
    %125 = memref.load %arg1[%c57] : memref<81xf32, #tpu.memory_space<smem>>
    %126 = vector.extract_strided_slice %99 {offsets = [1, 2], sizes = [5, 5], strides = [1, 1]} : vector<7x7xf32> to vector<5x5xf32>
    %127 = vector.broadcast %125 : f32 to vector<5x5xf32>
    %128 = arith.mulf %127, %126 : vector<5x5xf32>
    %129 = arith.addf %124, %128 : vector<5x5xf32>
    %c56 = arith.constant 56 : index
    %130 = memref.load %arg1[%c56] : memref<81xf32, #tpu.memory_space<smem>>
    %131 = vector.extract_strided_slice %99 {offsets = [2, 0], sizes = [5, 5], strides = [1, 1]} : vector<7x7xf32> to vector<5x5xf32>
    %132 = vector.broadcast %130 : f32 to vector<5x5xf32>
    %133 = arith.mulf %132, %131 : vector<5x5xf32>
    %134 = arith.addf %129, %133 : vector<5x5xf32>
    %c55 = arith.constant 55 : index
    %135 = memref.load %arg1[%c55] : memref<81xf32, #tpu.memory_space<smem>>
    %136 = vector.extract_strided_slice %99 {offsets = [2, 1], sizes = [5, 5], strides = [1, 1]} : vector<7x7xf32> to vector<5x5xf32>
    %137 = vector.broadcast %135 : f32 to vector<5x5xf32>
    %138 = arith.mulf %137, %136 : vector<5x5xf32>
    %139 = arith.addf %134, %138 : vector<5x5xf32>
    %c54 = arith.constant 54 : index
    %140 = memref.load %arg1[%c54] : memref<81xf32, #tpu.memory_space<smem>>
    %141 = vector.extract_strided_slice %99 {offsets = [2, 2], sizes = [5, 5], strides = [1, 1]} : vector<7x7xf32> to vector<5x5xf32>
    %142 = vector.broadcast %140 : f32 to vector<5x5xf32>
    %143 = arith.mulf %142, %141 : vector<5x5xf32>
    %144 = arith.addf %139, %143 : vector<5x5xf32>
    %145 = arith.negf %144 : vector<5x5xf32>
    %146 = math.exp %145 : vector<5x5xf32>
    %cst = arith.constant 1.000000e+00 : f32
    %147 = vector.broadcast %cst : f32 to vector<5x5xf32>
    %148 = arith.addf %147, %146 : vector<5x5xf32>
    %149 = arith.divf %147, %148 : vector<5x5xf32>
    %c0_5 = arith.constant 0 : index
    %c0_6 = arith.constant 0 : index
    %c0_7 = arith.constant 0 : index
    %c0_8 = arith.constant 0 : index
    %150 = vector.load %arg4[%c0_5, %c0_6, %c0_7, %c0_8] : memref<1x3x5x5xf32, #tpu.memory_space<vmem>>, vector<1x1x5x5xf32>
    %151 = vector.shape_cast %150 : vector<1x1x5x5xf32> to vector<5x5xf32>
    %152 = vector.shape_cast %149 : vector<5x5xf32> to vector<1x1x5x5xf32>
    tpu.vector_store %arg4[%c0_5, %c0_6, %c0_7, %c0_8], %152 {strides = array<i32>} : memref<1x3x5x5xf32, #tpu.memory_space<vmem>>, vector<1x1x5x5xf32>,
    %c1_9 = arith.constant 1 : index
    %153 = memref.load %arg2[%c1_9] : memref<3xf32, #tpu.memory_space<smem>>
    %154 = vector.broadcast %153 : f32 to vector<5x5xf32>
    %155 = vector.extract_strided_slice %1 {offsets = [0, 0, 0], sizes = [1, 7, 7], strides = [1, 1, 1]} : vector<3x7x7xf32> to vector<1x7x7xf32>
    %156 = vector.shape_cast %155 : vector<1x7x7xf32> to vector<7x7xf32>
    %c17 = arith.constant 17 : index
    %157 = memref.load %arg1[%c17] : memref<81xf32, #tpu.memory_space<smem>>
    %158 = vector.extract_strided_slice %156 {offsets = [0, 0], sizes = [5, 5], strides = [1, 1]} : vector<7x7xf32> to vector<5x5xf32>
    %159 = vector.broadcast %157 : f32 to vector<5x5xf32>
    %160 = arith.mulf %159, %158 : vector<5x5xf32>
    %161 = arith.addf %154, %160 : vector<5x5xf32>
    %c16 = arith.constant 16 : index
    %162 = memref.load %arg1[%c16] : memref<81xf32, #tpu.memory_space<smem>>
    %163 = vector.extract_strided_slice %156 {offsets = [0, 1], sizes = [5, 5], strides = [1, 1]} : vector<7x7xf32> to vector<5x5xf32>
    %164 = vector.broadcast %162 : f32 to vector<5x5xf32>
    %165 = arith.mulf %164, %163 : vector<5x5xf32>
    %166 = arith.addf %161, %165 : vector<5x5xf32>
    %c15 = arith.constant 15 : index
    %167 = memref.load %arg1[%c15] : memref<81xf32, #tpu.memory_space<smem>>
    %168 = vector.extract_strided_slice %156 {offsets = [0, 2], sizes = [5, 5], strides = [1, 1]} : vector<7x7xf32> to vector<5x5xf32>
    %169 = vector.broadcast %167 : f32 to vector<5x5xf32>
    %170 = arith.mulf %169, %168 : vector<5x5xf32>
    %171 = arith.addf %166, %170 : vector<5x5xf32>
    %c14 = arith.constant 14 : index
    %172 = memref.load %arg1[%c14] : memref<81xf32, #tpu.memory_space<smem>>
    %173 = vector.extract_strided_slice %156 {offsets = [1, 0], sizes = [5, 5], strides = [1, 1]} : vector<7x7xf32> to vector<5x5xf32>
    %174 = vector.broadcast %172 : f32 to vector<5x5xf32>
    %175 = arith.mulf %174, %173 : vector<5x5xf32>
    %176 = arith.addf %171, %175 : vector<5x5xf32>
    %c13 = arith.constant 13 : index
    %177 = memref.load %arg1[%c13] : memref<81xf32, #tpu.memory_space<smem>>
    %178 = vector.extract_strided_slice %156 {offsets = [1, 1], sizes = [5, 5], strides = [1, 1]} : vector<7x7xf32> to vector<5x5xf32>
    %179 = vector.broadcast %177 : f32 to vector<5x5xf32>
    %180 = arith.mulf %179, %178 : vector<5x5xf32>
    %181 = arith.addf %176, %180 : vector<5x5xf32>
    %c12 = arith.constant 12 : index
    %182 = memref.load %arg1[%c12] : memref<81xf32, #tpu.memory_space<smem>>
    %183 = vector.extract_strided_slice %156 {offsets = [1, 2], sizes = [5, 5], strides = [1, 1]} : vector<7x7xf32> to vector<5x5xf32>
    %184 = vector.broadcast %182 : f32 to vector<5x5xf32>
    %185 = arith.mulf %184, %183 : vector<5x5xf32>
    %186 = arith.addf %181, %185 : vector<5x5xf32>
    %c11 = arith.constant 11 : index
    %187 = memref.load %arg1[%c11] : memref<81xf32, #tpu.memory_space<smem>>
    %188 = vector.extract_strided_slice %156 {offsets = [2, 0], sizes = [5, 5], strides = [1, 1]} : vector<7x7xf32> to vector<5x5xf32>
    %189 = vector.broadcast %187 : f32 to vector<5x5xf32>
    %190 = arith.mulf %189, %188 : vector<5x5xf32>
    %191 = arith.addf %186, %190 : vector<5x5xf32>
    %c10 = arith.constant 10 : index
    %192 = memref.load %arg1[%c10] : memref<81xf32, #tpu.memory_space<smem>>
    %193 = vector.extract_strided_slice %156 {offsets = [2, 1], sizes = [5, 5], strides = [1, 1]} : vector<7x7xf32> to vector<5x5xf32>
    %194 = vector.broadcast %192 : f32 to vector<5x5xf32>
    %195 = arith.mulf %194, %193 : vector<5x5xf32>
    %196 = arith.addf %191, %195 : vector<5x5xf32>
    %c9 = arith.constant 9 : index
    %197 = memref.load %arg1[%c9] : memref<81xf32, #tpu.memory_space<smem>>
    %198 = vector.extract_strided_slice %156 {offsets = [2, 2], sizes = [5, 5], strides = [1, 1]} : vector<7x7xf32> to vector<5x5xf32>
    %199 = vector.broadcast %197 : f32 to vector<5x5xf32>
    %200 = arith.mulf %199, %198 : vector<5x5xf32>
    %201 = arith.addf %196, %200 : vector<5x5xf32>
    %202 = vector.extract_strided_slice %1 {offsets = [1, 0, 0], sizes = [1, 7, 7], strides = [1, 1, 1]} : vector<3x7x7xf32> to vector<1x7x7xf32>
    %203 = vector.shape_cast %202 : vector<1x7x7xf32> to vector<7x7xf32>
    %c44 = arith.constant 44 : index
    %204 = memref.load %arg1[%c44] : memref<81xf32, #tpu.memory_space<smem>>
    %205 = vector.extract_strided_slice %203 {offsets = [0, 0], sizes = [5, 5], strides = [1, 1]} : vector<7x7xf32> to vector<5x5xf32>
    %206 = vector.broadcast %204 : f32 to vector<5x5xf32>
    %207 = arith.mulf %206, %205 : vector<5x5xf32>
    %208 = arith.addf %201, %207 : vector<5x5xf32>
    %c43 = arith.constant 43 : index
    %209 = memref.load %arg1[%c43] : memref<81xf32, #tpu.memory_space<smem>>
    %210 = vector.extract_strided_slice %203 {offsets = [0, 1], sizes = [5, 5], strides = [1, 1]} : vector<7x7xf32> to vector<5x5xf32>
    %211 = vector.broadcast %209 : f32 to vector<5x5xf32>
    %212 = arith.mulf %211, %210 : vector<5x5xf32>
    %213 = arith.addf %208, %212 : vector<5x5xf32>
    %c42 = arith.constant 42 : index
    %214 = memref.load %arg1[%c42] : memref<81xf32, #tpu.memory_space<smem>>
    %215 = vector.extract_strided_slice %203 {offsets = [0, 2], sizes = [5, 5], strides = [1, 1]} : vector<7x7xf32> to vector<5x5xf32>
    %216 = vector.broadcast %214 : f32 to vector<5x5xf32>
    %217 = arith.mulf %216, %215 : vector<5x5xf32>
    %218 = arith.addf %213, %217 : vector<5x5xf32>
    %c41 = arith.constant 41 : index
    %219 = memref.load %arg1[%c41] : memref<81xf32, #tpu.memory_space<smem>>
    %220 = vector.extract_strided_slice %203 {offsets = [1, 0], sizes = [5, 5], strides = [1, 1]} : vector<7x7xf32> to vector<5x5xf32>
    %221 = vector.broadcast %219 : f32 to vector<5x5xf32>
    %222 = arith.mulf %221, %220 : vector<5x5xf32>
    %223 = arith.addf %218, %222 : vector<5x5xf32>
    %c40 = arith.constant 40 : index
    %224 = memref.load %arg1[%c40] : memref<81xf32, #tpu.memory_space<smem>>
    %225 = vector.extract_strided_slice %203 {offsets = [1, 1], sizes = [5, 5], strides = [1, 1]} : vector<7x7xf32> to vector<5x5xf32>
    %226 = vector.broadcast %224 : f32 to vector<5x5xf32>
    %227 = arith.mulf %226, %225 : vector<5x5xf32>
    %228 = arith.addf %223, %227 : vector<5x5xf32>
    %c39 = arith.constant 39 : index
    %229 = memref.load %arg1[%c39] : memref<81xf32, #tpu.memory_space<smem>>
    %230 = vector.extract_strided_slice %203 {offsets = [1, 2], sizes = [5, 5], strides = [1, 1]} : vector<7x7xf32> to vector<5x5xf32>
    %231 = vector.broadcast %229 : f32 to vector<5x5xf32>
    %232 = arith.mulf %231, %230 : vector<5x5xf32>
    %233 = arith.addf %228, %232 : vector<5x5xf32>
    %c38 = arith.constant 38 : index
    %234 = memref.load %arg1[%c38] : memref<81xf32, #tpu.memory_space<smem>>
    %235 = vector.extract_strided_slice %203 {offsets = [2, 0], sizes = [5, 5], strides = [1, 1]} : vector<7x7xf32> to vector<5x5xf32>
    %236 = vector.broadcast %234 : f32 to vector<5x5xf32>
    %237 = arith.mulf %236, %235 : vector<5x5xf32>
    %238 = arith.addf %233, %237 : vector<5x5xf32>
    %c37 = arith.constant 37 : index
    %239 = memref.load %arg1[%c37] : memref<81xf32, #tpu.memory_space<smem>>
    %240 = vector.extract_strided_slice %203 {offsets = [2, 1], sizes = [5, 5], strides = [1, 1]} : vector<7x7xf32> to vector<5x5xf32>
    %241 = vector.broadcast %239 : f32 to vector<5x5xf32>
    %242 = arith.mulf %241, %240 : vector<5x5xf32>
    %243 = arith.addf %238, %242 : vector<5x5xf32>
    %c36 = arith.constant 36 : index
    %244 = memref.load %arg1[%c36] : memref<81xf32, #tpu.memory_space<smem>>
    %245 = vector.extract_strided_slice %203 {offsets = [2, 2], sizes = [5, 5], strides = [1, 1]} : vector<7x7xf32> to vector<5x5xf32>
    %246 = vector.broadcast %244 : f32 to vector<5x5xf32>
    %247 = arith.mulf %246, %245 : vector<5x5xf32>
    %248 = arith.addf %243, %247 : vector<5x5xf32>
    %249 = vector.extract_strided_slice %1 {offsets = [2, 0, 0], sizes = [1, 7, 7], strides = [1, 1, 1]} : vector<3x7x7xf32> to vector<1x7x7xf32>
    %250 = vector.shape_cast %249 : vector<1x7x7xf32> to vector<7x7xf32>
    %c71 = arith.constant 71 : index
    %251 = memref.load %arg1[%c71] : memref<81xf32, #tpu.memory_space<smem>>
    %252 = vector.extract_strided_slice %250 {offsets = [0, 0], sizes = [5, 5], strides = [1, 1]} : vector<7x7xf32> to vector<5x5xf32>
    %253 = vector.broadcast %251 : f32 to vector<5x5xf32>
    %254 = arith.mulf %253, %252 : vector<5x5xf32>
    %255 = arith.addf %248, %254 : vector<5x5xf32>
    %c70 = arith.constant 70 : index
    %256 = memref.load %arg1[%c70] : memref<81xf32, #tpu.memory_space<smem>>
    %257 = vector.extract_strided_slice %250 {offsets = [0, 1], sizes = [5, 5], strides = [1, 1]} : vector<7x7xf32> to vector<5x5xf32>
    %258 = vector.broadcast %256 : f32 to vector<5x5xf32>
    %259 = arith.mulf %258, %257 : vector<5x5xf32>
    %260 = arith.addf %255, %259 : vector<5x5xf32>
    %c69 = arith.constant 69 : index
    %261 = memref.load %arg1[%c69] : memref<81xf32, #tpu.memory_space<smem>>
    %262 = vector.extract_strided_slice %250 {offsets = [0, 2], sizes = [5, 5], strides = [1, 1]} : vector<7x7xf32> to vector<5x5xf32>
    %263 = vector.broadcast %261 : f32 to vector<5x5xf32>
    %264 = arith.mulf %263, %262 : vector<5x5xf32>
    %265 = arith.addf %260, %264 : vector<5x5xf32>
    %c68 = arith.constant 68 : index
    %266 = memref.load %arg1[%c68] : memref<81xf32, #tpu.memory_space<smem>>
    %267 = vector.extract_strided_slice %250 {offsets = [1, 0], sizes = [5, 5], strides = [1, 1]} : vector<7x7xf32> to vector<5x5xf32>
    %268 = vector.broadcast %266 : f32 to vector<5x5xf32>
    %269 = arith.mulf %268, %267 : vector<5x5xf32>
    %270 = arith.addf %265, %269 : vector<5x5xf32>
    %c67 = arith.constant 67 : index
    %271 = memref.load %arg1[%c67] : memref<81xf32, #tpu.memory_space<smem>>
    %272 = vector.extract_strided_slice %250 {offsets = [1, 1], sizes = [5, 5], strides = [1, 1]} : vector<7x7xf32> to vector<5x5xf32>
    %273 = vector.broadcast %271 : f32 to vector<5x5xf32>
    %274 = arith.mulf %273, %272 : vector<5x5xf32>
    %275 = arith.addf %270, %274 : vector<5x5xf32>
    %c66 = arith.constant 66 : index
    %276 = memref.load %arg1[%c66] : memref<81xf32, #tpu.memory_space<smem>>
    %277 = vector.extract_strided_slice %250 {offsets = [1, 2], sizes = [5, 5], strides = [1, 1]} : vector<7x7xf32> to vector<5x5xf32>
    %278 = vector.broadcast %276 : f32 to vector<5x5xf32>
    %279 = arith.mulf %278, %277 : vector<5x5xf32>
    %280 = arith.addf %275, %279 : vector<5x5xf32>
    %c65 = arith.constant 65 : index
    %281 = memref.load %arg1[%c65] : memref<81xf32, #tpu.memory_space<smem>>
    %282 = vector.extract_strided_slice %250 {offsets = [2, 0], sizes = [5, 5], strides = [1, 1]} : vector<7x7xf32> to vector<5x5xf32>
    %283 = vector.broadcast %281 : f32 to vector<5x5xf32>
    %284 = arith.mulf %283, %282 : vector<5x5xf32>
    %285 = arith.addf %280, %284 : vector<5x5xf32>
    %c64 = arith.constant 64 : index
    %286 = memref.load %arg1[%c64] : memref<81xf32, #tpu.memory_space<smem>>
    %287 = vector.extract_strided_slice %250 {offsets = [2, 1], sizes = [5, 5], strides = [1, 1]} : vector<7x7xf32> to vector<5x5xf32>
    %288 = vector.broadcast %286 : f32 to vector<5x5xf32>
    %289 = arith.mulf %288, %287 : vector<5x5xf32>
    %290 = arith.addf %285, %289 : vector<5x5xf32>
    %c63 = arith.constant 63 : index
    %291 = memref.load %arg1[%c63] : memref<81xf32, #tpu.memory_space<smem>>
    %292 = vector.extract_strided_slice %250 {offsets = [2, 2], sizes = [5, 5], strides = [1, 1]} : vector<7x7xf32> to vector<5x5xf32>
    %293 = vector.broadcast %291 : f32 to vector<5x5xf32>
    %294 = arith.mulf %293, %292 : vector<5x5xf32>
    %295 = arith.addf %290, %294 : vector<5x5xf32>
    %296 = arith.negf %295 : vector<5x5xf32>
    %297 = math.exp %296 : vector<5x5xf32>
    %cst_10 = arith.constant 1.000000e+00 : f32
    %298 = vector.broadcast %cst_10 : f32 to vector<5x5xf32>
    %299 = arith.addf %298, %297 : vector<5x5xf32>
    %300 = arith.divf %298, %299 : vector<5x5xf32>
    %c0_11 = arith.constant 0 : index
    %c1_12 = arith.constant 1 : index
    %c0_13 = arith.constant 0 : index
    %c0_14 = arith.constant 0 : index
    %301 = vector.load %arg4[%c0_11, %c1_12, %c0_13, %c0_14] : memref<1x3x5x5xf32, #tpu.memory_space<vmem>>, vector<1x1x5x5xf32>
    %302 = vector.shape_cast %301 : vector<1x1x5x5xf32> to vector<5x5xf32>
    %303 = vector.shape_cast %300 : vector<5x5xf32> to vector<1x1x5x5xf32>
    tpu.vector_store %arg4[%c0_11, %c1_12, %c0_13, %c0_14], %303 {strides = array<i32>} : memref<1x3x5x5xf32, #tpu.memory_space<vmem>>, vector<1x1x5x5xf32>,
    %c2_15 = arith.constant 2 : index
    %304 = memref.load %arg2[%c2_15] : memref<3xf32, #tpu.memory_space<smem>>
    %305 = vector.broadcast %304 : f32 to vector<5x5xf32>
    %306 = vector.extract_strided_slice %1 {offsets = [0, 0, 0], sizes = [1, 7, 7], strides = [1, 1, 1]} : vector<3x7x7xf32> to vector<1x7x7xf32>
    %307 = vector.shape_cast %306 : vector<1x7x7xf32> to vector<7x7xf32>
    %c26 = arith.constant 26 : index
    %308 = memref.load %arg1[%c26] : memref<81xf32, #tpu.memory_space<smem>>
    %309 = vector.extract_strided_slice %307 {offsets = [0, 0], sizes = [5, 5], strides = [1, 1]} : vector<7x7xf32> to vector<5x5xf32>
    %310 = vector.broadcast %308 : f32 to vector<5x5xf32>
    %311 = arith.mulf %310, %309 : vector<5x5xf32>
    %312 = arith.addf %305, %311 : vector<5x5xf32>
    %c25 = arith.constant 25 : index
    %313 = memref.load %arg1[%c25] : memref<81xf32, #tpu.memory_space<smem>>
    %314 = vector.extract_strided_slice %307 {offsets = [0, 1], sizes = [5, 5], strides = [1, 1]} : vector<7x7xf32> to vector<5x5xf32>
    %315 = vector.broadcast %313 : f32 to vector<5x5xf32>
    %316 = arith.mulf %315, %314 : vector<5x5xf32>
    %317 = arith.addf %312, %316 : vector<5x5xf32>
    %c24 = arith.constant 24 : index
    %318 = memref.load %arg1[%c24] : memref<81xf32, #tpu.memory_space<smem>>
    %319 = vector.extract_strided_slice %307 {offsets = [0, 2], sizes = [5, 5], strides = [1, 1]} : vector<7x7xf32> to vector<5x5xf32>
    %320 = vector.broadcast %318 : f32 to vector<5x5xf32>
    %321 = arith.mulf %320, %319 : vector<5x5xf32>
    %322 = arith.addf %317, %321 : vector<5x5xf32>
    %c23 = arith.constant 23 : index
    %323 = memref.load %arg1[%c23] : memref<81xf32, #tpu.memory_space<smem>>
    %324 = vector.extract_strided_slice %307 {offsets = [1, 0], sizes = [5, 5], strides = [1, 1]} : vector<7x7xf32> to vector<5x5xf32>
    %325 = vector.broadcast %323 : f32 to vector<5x5xf32>
    %326 = arith.mulf %325, %324 : vector<5x5xf32>
    %327 = arith.addf %322, %326 : vector<5x5xf32>
    %c22 = arith.constant 22 : index
    %328 = memref.load %arg1[%c22] : memref<81xf32, #tpu.memory_space<smem>>
    %329 = vector.extract_strided_slice %307 {offsets = [1, 1], sizes = [5, 5], strides = [1, 1]} : vector<7x7xf32> to vector<5x5xf32>
    %330 = vector.broadcast %328 : f32 to vector<5x5xf32>
    %331 = arith.mulf %330, %329 : vector<5x5xf32>
    %332 = arith.addf %327, %331 : vector<5x5xf32>
    %c21 = arith.constant 21 : index
    %333 = memref.load %arg1[%c21] : memref<81xf32, #tpu.memory_space<smem>>
    %334 = vector.extract_strided_slice %307 {offsets = [1, 2], sizes = [5, 5], strides = [1, 1]} : vector<7x7xf32> to vector<5x5xf32>
    %335 = vector.broadcast %333 : f32 to vector<5x5xf32>
    %336 = arith.mulf %335, %334 : vector<5x5xf32>
    %337 = arith.addf %332, %336 : vector<5x5xf32>
    %c20 = arith.constant 20 : index
    %338 = memref.load %arg1[%c20] : memref<81xf32, #tpu.memory_space<smem>>
    %339 = vector.extract_strided_slice %307 {offsets = [2, 0], sizes = [5, 5], strides = [1, 1]} : vector<7x7xf32> to vector<5x5xf32>
    %340 = vector.broadcast %338 : f32 to vector<5x5xf32>
    %341 = arith.mulf %340, %339 : vector<5x5xf32>
    %342 = arith.addf %337, %341 : vector<5x5xf32>
    %c19 = arith.constant 19 : index
    %343 = memref.load %arg1[%c19] : memref<81xf32, #tpu.memory_space<smem>>
    %344 = vector.extract_strided_slice %307 {offsets = [2, 1], sizes = [5, 5], strides = [1, 1]} : vector<7x7xf32> to vector<5x5xf32>
    %345 = vector.broadcast %343 : f32 to vector<5x5xf32>
    %346 = arith.mulf %345, %344 : vector<5x5xf32>
    %347 = arith.addf %342, %346 : vector<5x5xf32>
    %c18 = arith.constant 18 : index
    %348 = memref.load %arg1[%c18] : memref<81xf32, #tpu.memory_space<smem>>
    %349 = vector.extract_strided_slice %307 {offsets = [2, 2], sizes = [5, 5], strides = [1, 1]} : vector<7x7xf32> to vector<5x5xf32>
    %350 = vector.broadcast %348 : f32 to vector<5x5xf32>
    %351 = arith.mulf %350, %349 : vector<5x5xf32>
    %352 = arith.addf %347, %351 : vector<5x5xf32>
    %353 = vector.extract_strided_slice %1 {offsets = [1, 0, 0], sizes = [1, 7, 7], strides = [1, 1, 1]} : vector<3x7x7xf32> to vector<1x7x7xf32>
    %354 = vector.shape_cast %353 : vector<1x7x7xf32> to vector<7x7xf32>
    %c53 = arith.constant 53 : index
    %355 = memref.load %arg1[%c53] : memref<81xf32, #tpu.memory_space<smem>>
    %356 = vector.extract_strided_slice %354 {offsets = [0, 0], sizes = [5, 5], strides = [1, 1]} : vector<7x7xf32> to vector<5x5xf32>
    %357 = vector.broadcast %355 : f32 to vector<5x5xf32>
    %358 = arith.mulf %357, %356 : vector<5x5xf32>
    %359 = arith.addf %352, %358 : vector<5x5xf32>
    %c52 = arith.constant 52 : index
    %360 = memref.load %arg1[%c52] : memref<81xf32, #tpu.memory_space<smem>>
    %361 = vector.extract_strided_slice %354 {offsets = [0, 1], sizes = [5, 5], strides = [1, 1]} : vector<7x7xf32> to vector<5x5xf32>
    %362 = vector.broadcast %360 : f32 to vector<5x5xf32>
    %363 = arith.mulf %362, %361 : vector<5x5xf32>
    %364 = arith.addf %359, %363 : vector<5x5xf32>
    %c51 = arith.constant 51 : index
    %365 = memref.load %arg1[%c51] : memref<81xf32, #tpu.memory_space<smem>>
    %366 = vector.extract_strided_slice %354 {offsets = [0, 2], sizes = [5, 5], strides = [1, 1]} : vector<7x7xf32> to vector<5x5xf32>
    %367 = vector.broadcast %365 : f32 to vector<5x5xf32>
    %368 = arith.mulf %367, %366 : vector<5x5xf32>
    %369 = arith.addf %364, %368 : vector<5x5xf32>
    %c50 = arith.constant 50 : index
    %370 = memref.load %arg1[%c50] : memref<81xf32, #tpu.memory_space<smem>>
    %371 = vector.extract_strided_slice %354 {offsets = [1, 0], sizes = [5, 5], strides = [1, 1]} : vector<7x7xf32> to vector<5x5xf32>
    %372 = vector.broadcast %370 : f32 to vector<5x5xf32>
    %373 = arith.mulf %372, %371 : vector<5x5xf32>
    %374 = arith.addf %369, %373 : vector<5x5xf32>
    %c49 = arith.constant 49 : index
    %375 = memref.load %arg1[%c49] : memref<81xf32, #tpu.memory_space<smem>>
    %376 = vector.extract_strided_slice %354 {offsets = [1, 1], sizes = [5, 5], strides = [1, 1]} : vector<7x7xf32> to vector<5x5xf32>
    %377 = vector.broadcast %375 : f32 to vector<5x5xf32>
    %378 = arith.mulf %377, %376 : vector<5x5xf32>
    %379 = arith.addf %374, %378 : vector<5x5xf32>
    %c48 = arith.constant 48 : index
    %380 = memref.load %arg1[%c48] : memref<81xf32, #tpu.memory_space<smem>>
    %381 = vector.extract_strided_slice %354 {offsets = [1, 2], sizes = [5, 5], strides = [1, 1]} : vector<7x7xf32> to vector<5x5xf32>
    %382 = vector.broadcast %380 : f32 to vector<5x5xf32>
    %383 = arith.mulf %382, %381 : vector<5x5xf32>
    %384 = arith.addf %379, %383 : vector<5x5xf32>
    %c47 = arith.constant 47 : index
    %385 = memref.load %arg1[%c47] : memref<81xf32, #tpu.memory_space<smem>>
    %386 = vector.extract_strided_slice %354 {offsets = [2, 0], sizes = [5, 5], strides = [1, 1]} : vector<7x7xf32> to vector<5x5xf32>
    %387 = vector.broadcast %385 : f32 to vector<5x5xf32>
    %388 = arith.mulf %387, %386 : vector<5x5xf32>
    %389 = arith.addf %384, %388 : vector<5x5xf32>
    %c46 = arith.constant 46 : index
    %390 = memref.load %arg1[%c46] : memref<81xf32, #tpu.memory_space<smem>>
    %391 = vector.extract_strided_slice %354 {offsets = [2, 1], sizes = [5, 5], strides = [1, 1]} : vector<7x7xf32> to vector<5x5xf32>
    %392 = vector.broadcast %390 : f32 to vector<5x5xf32>
    %393 = arith.mulf %392, %391 : vector<5x5xf32>
    %394 = arith.addf %389, %393 : vector<5x5xf32>
    %c45 = arith.constant 45 : index
    %395 = memref.load %arg1[%c45] : memref<81xf32, #tpu.memory_space<smem>>
    %396 = vector.extract_strided_slice %354 {offsets = [2, 2], sizes = [5, 5], strides = [1, 1]} : vector<7x7xf32> to vector<5x5xf32>
    %397 = vector.broadcast %395 : f32 to vector<5x5xf32>
    %398 = arith.mulf %397, %396 : vector<5x5xf32>
    %399 = arith.addf %394, %398 : vector<5x5xf32>
    %400 = vector.extract_strided_slice %1 {offsets = [2, 0, 0], sizes = [1, 7, 7], strides = [1, 1, 1]} : vector<3x7x7xf32> to vector<1x7x7xf32>
    %401 = vector.shape_cast %400 : vector<1x7x7xf32> to vector<7x7xf32>
    %c80 = arith.constant 80 : index
    %402 = memref.load %arg1[%c80] : memref<81xf32, #tpu.memory_space<smem>>
    %403 = vector.extract_strided_slice %401 {offsets = [0, 0], sizes = [5, 5], strides = [1, 1]} : vector<7x7xf32> to vector<5x5xf32>
    %404 = vector.broadcast %402 : f32 to vector<5x5xf32>
    %405 = arith.mulf %404, %403 : vector<5x5xf32>
    %406 = arith.addf %399, %405 : vector<5x5xf32>
    %c79 = arith.constant 79 : index
    %407 = memref.load %arg1[%c79] : memref<81xf32, #tpu.memory_space<smem>>
    %408 = vector.extract_strided_slice %401 {offsets = [0, 1], sizes = [5, 5], strides = [1, 1]} : vector<7x7xf32> to vector<5x5xf32>
    %409 = vector.broadcast %407 : f32 to vector<5x5xf32>
    %410 = arith.mulf %409, %408 : vector<5x5xf32>
    %411 = arith.addf %406, %410 : vector<5x5xf32>
    %c78 = arith.constant 78 : index
    %412 = memref.load %arg1[%c78] : memref<81xf32, #tpu.memory_space<smem>>
    %413 = vector.extract_strided_slice %401 {offsets = [0, 2], sizes = [5, 5], strides = [1, 1]} : vector<7x7xf32> to vector<5x5xf32>
    %414 = vector.broadcast %412 : f32 to vector<5x5xf32>
    %415 = arith.mulf %414, %413 : vector<5x5xf32>
    %416 = arith.addf %411, %415 : vector<5x5xf32>
    %c77 = arith.constant 77 : index
    %417 = memref.load %arg1[%c77] : memref<81xf32, #tpu.memory_space<smem>>
    %418 = vector.extract_strided_slice %401 {offsets = [1, 0], sizes = [5, 5], strides = [1, 1]} : vector<7x7xf32> to vector<5x5xf32>
    %419 = vector.broadcast %417 : f32 to vector<5x5xf32>
    %420 = arith.mulf %419, %418 : vector<5x5xf32>
    %421 = arith.addf %416, %420 : vector<5x5xf32>
    %c76 = arith.constant 76 : index
    %422 = memref.load %arg1[%c76] : memref<81xf32, #tpu.memory_space<smem>>
    %423 = vector.extract_strided_slice %401 {offsets = [1, 1], sizes = [5, 5], strides = [1, 1]} : vector<7x7xf32> to vector<5x5xf32>
    %424 = vector.broadcast %422 : f32 to vector<5x5xf32>
    %425 = arith.mulf %424, %423 : vector<5x5xf32>
    %426 = arith.addf %421, %425 : vector<5x5xf32>
    %c75 = arith.constant 75 : index
    %427 = memref.load %arg1[%c75] : memref<81xf32, #tpu.memory_space<smem>>
    %428 = vector.extract_strided_slice %401 {offsets = [1, 2], sizes = [5, 5], strides = [1, 1]} : vector<7x7xf32> to vector<5x5xf32>
    %429 = vector.broadcast %427 : f32 to vector<5x5xf32>
    %430 = arith.mulf %429, %428 : vector<5x5xf32>
    %431 = arith.addf %426, %430 : vector<5x5xf32>
    %c74 = arith.constant 74 : index
    %432 = memref.load %arg1[%c74] : memref<81xf32, #tpu.memory_space<smem>>
    %433 = vector.extract_strided_slice %401 {offsets = [2, 0], sizes = [5, 5], strides = [1, 1]} : vector<7x7xf32> to vector<5x5xf32>
    %434 = vector.broadcast %432 : f32 to vector<5x5xf32>
    %435 = arith.mulf %434, %433 : vector<5x5xf32>
    %436 = arith.addf %431, %435 : vector<5x5xf32>
    %c73 = arith.constant 73 : index
    %437 = memref.load %arg1[%c73] : memref<81xf32, #tpu.memory_space<smem>>
    %438 = vector.extract_strided_slice %401 {offsets = [2, 1], sizes = [5, 5], strides = [1, 1]} : vector<7x7xf32> to vector<5x5xf32>
    %439 = vector.broadcast %437 : f32 to vector<5x5xf32>
    %440 = arith.mulf %439, %438 : vector<5x5xf32>
    %441 = arith.addf %436, %440 : vector<5x5xf32>
    %c72 = arith.constant 72 : index
    %442 = memref.load %arg1[%c72] : memref<81xf32, #tpu.memory_space<smem>>
    %443 = vector.extract_strided_slice %401 {offsets = [2, 2], sizes = [5, 5], strides = [1, 1]} : vector<7x7xf32> to vector<5x5xf32>
    %444 = vector.broadcast %442 : f32 to vector<5x5xf32>
    %445 = arith.mulf %444, %443 : vector<5x5xf32>
    %446 = arith.addf %441, %445 : vector<5x5xf32>
    %447 = arith.negf %446 : vector<5x5xf32>
    %448 = math.exp %447 : vector<5x5xf32>
    %cst_16 = arith.constant 1.000000e+00 : f32
    %449 = vector.broadcast %cst_16 : f32 to vector<5x5xf32>
    %450 = arith.addf %449, %448 : vector<5x5xf32>
    %451 = arith.divf %449, %450 : vector<5x5xf32>
    %c0_17 = arith.constant 0 : index
    %c2_18 = arith.constant 2 : index
    %c0_19 = arith.constant 0 : index
    %c0_20 = arith.constant 0 : index
    %452 = vector.load %arg4[%c0_17, %c2_18, %c0_19, %c0_20] : memref<1x3x5x5xf32, #tpu.memory_space<vmem>>, vector<1x1x5x5xf32>
    %453 = vector.shape_cast %452 : vector<1x1x5x5xf32> to vector<5x5xf32>
    %454 = vector.shape_cast %451 : vector<5x5xf32> to vector<1x1x5x5xf32>
    tpu.vector_store %arg4[%c0_17, %c2_18, %c0_19, %c0_20], %454 {strides = array<i32>} : memref<1x3x5x5xf32, #tpu.memory_space<vmem>>, vector<1x1x5x5xf32>,
    return
  }
  func.func @transform_0(%arg0: i32) -> i32 {
    %c0_i32 = arith.constant 0 : i32
    %c0_i32_0 = arith.constant 0 : i32
    return %c0_i32 : i32
  }
  func.func @transform_1(%arg0: i32) -> i32 {
    %c0_i32 = arith.constant 0 : i32
    %c0_i32_0 = arith.constant 0 : i32
    return %c0_i32 : i32
  }
  func.func @transform_2(%arg0: i32) -> (i32, i32, i32, i32) {
    %c0_i32 = arith.constant 0 : i32
    %c0_i32_0 = arith.constant 0 : i32
    %c0_i32_1 = arith.constant 0 : i32
    %c0_i32_2 = arith.constant 0 : i32
    return %arg0, %c0_i32, %c0_i32_0, %c0_i32_1 : i32, i32, i32, i32
  }
  func.func @transform_3(%arg0: i32) -> (i32, i32, i32, i32) {
    %c0_i32 = arith.constant 0 : i32
    %c0_i32_0 = arith.constant 0 : i32
    %c0_i32_1 = arith.constant 0 : i32
    %c0_i32_2 = arith.constant 0 : i32
    return %arg0, %c0_i32, %c0_i32_0, %c0_i32_1 : i32, i32, i32, i32
  }
}

</mosaic_0001>

<bundles_post_ra>
// kernel: conv_transpose_sigmoid.1
= control target key start
LH: loop header
LB: loop body
LE: loop exit
PB: predicated region body
PF: predicated region fallthrough
CT: control target
= control target key end

     0   :  { %8 = vsyncpa [#allocation3], 0  ;;  %s1064_s0 = inlined_call_operand.vmem [shape: f32[81], index: 0, kind: input, shape index: {}]   ;;  %s1065_s1 = inlined_call_operand.vmem [shape: f32[3], index: 1, kind: input, shape index: {}]   ;;  %s1066_s2 = inlined_call_operand.vmem [shape: f32[1,3,7,7], index: 2, kind: input, shape index: {}]   ;;  %s1067_s3 = inlined_call_operand.vmem [shape: f32[1,3,5,5], index: 3, kind: output, shape index: {}]  }
   0x1   :  { %s16_s14 = sshll.u32 %s1064_s0, 4  ;;  %s17_s14 = int_to_ptr.vmem [resolvable:$true] %s16_s14 }
   0x2   :  { %9 = vsyncpa [#allocation5], 0  ;;  %s26_s17 = sshll.u32 %s1065_s1, 4  ;;  %s811_s18 = scalar_lea.vmem %s17_s14, 16  ;;  %s27_s17 = int_to_ptr.vmem [resolvable:$true] %s26_s17 }
   0x3   :  { %p812_p0 = scmp.ne.s32.totalorder %s17_s14, %s811_s18  ;;  %p816_p1 = scmp.lt.s32.totalorder %s17_s14, %s17_s14 }
   0x4   :  { %p817_p2 = scmp.lt.s32.totalorder %s811_s18, %s811_s18 }
   0x6   :  { %p818_p3 = por %p817_p2, %p816_p1 }
   0x8   :  { %p819_p4 = pnand %p818_p3, %p812_p0 }
   0xa   :  { %822 = shalt.err (!%p819_p4)
}
   0xb   :  { %s839_s19 = smov [#allocation2]   ;;  %s823_s20 = scalar_lea.vmem %s27_s17, 16 }
   0xc   :  { %19 = dma.vmem_to_smem %s17_s14, 16, %s839_s19, [#allocation3]  }
   0xd   :  { %p824_p5 = scmp.ne.s32.totalorder %s27_s17, %s823_s20  ;;  %p828_p6 = scmp.lt.s32.totalorder %s27_s17, %s27_s17 }
   0xe   :  { %p829_p7 = scmp.lt.s32.totalorder %s823_s20, %s823_s20 }
  0x10   :  { %p830_p8 = por %p829_p7, %p828_p6 }
  0x12   :  { %p831_p9 = pnand %p830_p8, %p824_p5 }
  0x14   :  { %834 = shalt.err (!%p831_p9)
}
  0x15   :  { %s840_s0 = smov [#allocation4]  }
  0x16   :  { %29 = dma.vmem_to_smem %s27_s17, 16, %s840_s0, [#allocation5]  }
  0x17   :  { %835 = dma.done.wait [#allocation3], 16  }
  0x18   :  { %836 = vsyncadd [#allocation3], 4294967280 }
  0x19   :  { %837 = dma.done.wait [#allocation5], 16  }
  0x1a   :  { %838 = vsyncadd [#allocation5], 4294967280 }
  0x1b   :  { %38 = sfence }
  0x1c   :  { %s767_s1 = sld [smem:[#allocation2 + $0x19]]  ;;  %v872_v0 = vld [vmem:[%s1066_s2] sm:$0x7f]  ;;  %s841_s4 = smov 127   ;;  %v915_v49 = vld [vmem:[%s1066_s2 + $0x8] sm:$0x7f] }
  0x1d   :  { %s709_s21 = sld [smem:[#allocation2 + $0x7]]  ;;  %s842_s8 = smov 126   ;;  %vm260_vm0 = vcmask 36864  }
  0x1e   :  { %s710_s22 = sld [smem:[#allocation2 + $0x6]] }
  0x1f   :  { %s737_s23 = sld [smem:[#allocation2 + $0x10]] }
  0x20   :  { %s768_s26 = sld [smem:[#allocation2 + $0x18]] }
  0x21   :  { %s738_s27 = sld [smem:[#allocation2 + $0xf]] }
  0x22   :  { %v489_v1 = vstv %s767_s1  ;;  %s740_s28 = sld [smem:[#allocation2 + $0xd]] }
  0x23   :  { %v490_v2 = vmul.f32 %v489_v1, %v872_v0  ;;  %v49_v3 = vstv %s709_s21  ;;  %s712_s29 = sld [smem:[#allocation2 + $0x4]] }
  0x24   :  { %v50_v4 = vmul.f32 %v49_v3, %v872_v0  ;;  %v57_v5 = vstv %s710_s22  ;;  %s713_s30 = sld [smem:[#allocation2 + $0x3]] }
  0x25   :  { %492 = vrot.lane.b32.xlu1 %v490_v2, %s841_s4  ;;  %v58_v6 = vmul.f32 %v57_v5, %v872_v0  ;;  %v269_v7 = vstv %s737_s23  ;;  %s770_s5 = sld [smem:[#allocation2 + $0x16]] }
  0x26   :  { %52 = vrot.lane.b32.xlu0 %v50_v4, %s841_s4  ;;  %v270_v8 = vmul.f32 %v269_v7, %v872_v0  ;;  %v497_v9 = vstv %s768_s26  ;;  %s771_s6 = sld [smem:[#allocation2 + $0x15]] }
  0x27   :  { %v277_v10 = vstv %s738_s27  ;;  %s741_s7 = sld [smem:[#allocation2 + $0xc]]  ;;  %v498_v12 = vmul.f32 %v497_v9, %v872_v0 }
  0x28   :  { %v292_v11 = vstv %s740_s28  ;;  %v278_v15 = vmul.f32 %v277_v10, %v872_v0  ;;  %s743_s9 = sld [smem:[#allocation2 + $0xa]] }
  0x29   :  { %60 = vrot.lane.b32.xlu1 %v58_v6, %s842_s8  ;;  %v293_v13 = vmul.f32 %v292_v11, %v872_v0  ;;  %v72_v14 = vstv %s712_s29  ;;  %s715_s10 = sld [smem:[#allocation2 + $0x1]] }
  0x2a   :  { %272 = vrot.lane.b32.xlu0 %v270_v8, %s841_s4  ;;  %v73_v16 = vmul.f32 %v72_v14, %v872_v0  ;;  %v81_v17 = vstv %s713_s30  ;;  %s105_s11 = sld [smem:[#allocation2]] }
  0x2b   :  { %v512_v18 = vstv %s770_s5  ;;  %v295_v19 = vrot.slane %v293_v13, 1  ;;  %v82_v20 = vmul.f32 %v81_v17, %v872_v0  ;;  %s773_s12 = sld [smem:[#allocation2 + $0x13]] }
  0x2c   :  { %v75_v21 = vrot.slane %v73_v16, 1  ;;  %v513_v22 = vmul.f32 %v512_v18, %v872_v0  ;;  %v521_v23 = vstv %s771_s6  ;;  %s774_s13 = sld [smem:[#allocation2 + $0x12]] }
  0x2d   :  { %500 = vrot.lane.b32.xlu1 %v498_v12, %s842_s8  ;;  %v301_v24 = vstv %s741_s7  ;;  %v84_v25 = vrot.slane %v82_v20, 1  ;;  %v522_v26 = vmul.f32 %v521_v23, %v872_v0  ;;  %s744_s14 = sld [smem:[#allocation2 + $0x9]] }
  0x2e   :  { %280 = vrot.lane.b32.xlu0 %v278_v15, %s842_s8  ;;  %v515_v27 = vrot.slane %v513_v22, 1  ;;  %v302_v28 = vmul.f32 %v301_v24, %v872_v0  ;;  %v317_v29 = vstv %s743_s9  ;;  %s746_s15 = sld [smem:[#allocation2 + $0x2b]] }
  0x2f   :  { %v97_v30 = vstv %s715_s10  ;;  %v524_v31 = vrot.slane %v522_v26, 1  ;;  %v318_v32 = vmul.f32 %v317_v29, %v872_v0  ;;  %s717_s16 = sld [smem:[#allocation2 + $0x22]] }
  0x30   :  { %v304_v33 = vrot.slane %v302_v28, 1  ;;  %v98_v34 = vmul.f32 %v97_v30, %v872_v0  ;;  %v106_v35 = vstv %s105_s11  ;;  %s718_s17 = sld [smem:[#allocation2 + $0x21]] }
  0x31   :  { %296 = vrot.lane.b32.xlu1 %v295_v19, %s841_s4  ;;  %v537_v36 = vstv %s773_s12  ;;  %v320_v37 = vrot.slane %v318_v32, 2  ;;  %v107_v38 = vmul.f32 %v106_v35, %v872_v0  ;;  %s776_s18 = sld [smem:[#allocation2 + $0x34]]  ;;  %v962_v35 = vld [vmem:[%s1066_s2 + $0x10] sm:$0x7f] }
  0x32   :  { %76 = vrot.lane.b32.xlu0 %v75_v21, %s841_s4  ;;  %v100_v39 = vrot.slane %v98_v34, 2  ;;  %v538_v40 = vmul.f32 %v537_v36, %v872_v0  ;;  %v546_v41 = vstv %s774_s13  ;;  %s906_s19 = sld [smem:[#allocation2 + $0x33]] }
  0x33   :  { %v326_v42 = vstv %s744_s14  ;;  %v109_v43 = vrot.slane %v107_v38, 2  ;;  %v547_v44 = vmul.f32 %v546_v41, %v872_v0  ;;  %s909_s20 = sld [smem:[#allocation2 + $0x2a]] }
  0x34   :  { %v540_v45 = vrot.slane %v538_v40, 2  ;;  %v327_v46 = vmul.f32 %v326_v42, %v872_v0  ;;  %v339_v50 = vstv %s746_s15  ;;  %s749_s21 = sld [smem:[#allocation2 + $0x28]] }
  0x35   :  { %85 = vrot.lane.b32.xlu1 %v84_v25, %s842_s8  ;;  %v549_v47 = vrot.slane %v547_v44, 2  ;;  %v119_v51 = vstv %s717_s16  ;;  %s720_s22 = sld [smem:[#allocation2 + $0x1f]]  ;;  %v340_v52 = vmul.f32 %v339_v50, %v915_v49 }
  0x36   :  { %516 = vrot.lane.b32.xlu0 %v515_v27, %s841_s4  ;;  %v329_v48 = vrot.slane %v327_v46, 2  ;;  %v120_v53 = vmul.f32 %v119_v51, %v915_v49  ;;  %v127_v54 = vstv %s718_s17  ;;  %s721_s23 = sld [smem:[#allocation2 + $0x1e]] }
  0x37   :  { %v559_v55 = vstv %s776_s18  ;;  %s779_s24 = sld [smem:[#allocation2 + $0x31]]  ;;  %v128_v56 = vmul.f32 %v127_v54, %v915_v49 }
  0x38   :  { %v560_v57 = vmul.f32 %v559_v55, %v915_v49  ;;  %v567_v58 = vstv %s906_s19  ;;  %s780_s25 = sld [smem:[#allocation2 + $0x30]] }
  0x39   :  { %525 = vrot.lane.b32.xlu1 %v524_v31, %s842_s8  ;;  %v347_v60 = vstv %s909_s20  ;;  %s750_s26 = sld [smem:[#allocation2 + $0x27]]  ;;  %v568_v62 = vmul.f32 %v567_v58, %v915_v49 }
  0x3a   :  { %305 = vrot.lane.b32.xlu0 %v304_v33, %s842_s8  ;;  %v362_v59 = vstv %s749_s21  ;;  %v348_v1 = vmul.f32 %v347_v60, %v915_v49  ;;  %s752_s27 = sld [smem:[#allocation2 + $0x25]] }
  0x3b   :  { %v142_v61 = vstv %s720_s22  ;;  %v363_v63 = vmul.f32 %v362_v59, %v915_v49  ;;  %s723_s28 = sld [smem:[#allocation2 + $0x1c]] }
  0x3c   :  { %v143_v2 = vmul.f32 %v142_v61, %v915_v49  ;;  %v151_v3 = vstv %s721_s23  ;;  %s724_s29 = sld [smem:[#allocation2 + $0x1b]] }
  0x3d   :  { %321 = vrot.lane.b32.xlu1 %v320_v37, %s841_s4  ;;  %v582_v4 = vstv %s779_s24  ;;  %v365_v5 = vrot.slane %v363_v63, 1  ;;  %v152_v6 = vmul.f32 %v151_v3, %v915_v49  ;;  %s782_s30 = sld [smem:[#allocation2 + $0x2e]] }
  0x3e   :  { %101 = vrot.lane.b32.xlu0 %v100_v39, %s841_s4  ;;  %v145_v7 = vrot.slane %v143_v2, 1  ;;  %v583_v8 = vmul.f32 %v582_v4, %v915_v49  ;;  %v591_v9 = vstv %s780_s25  ;;  %s783_s5 = sld [smem:[#allocation2 + $0x2d]] }
  0x3f   :  { %v371_v10 = vstv %s750_s26  ;;  %v154_v11 = vrot.slane %v152_v6, 1  ;;  %v592_v12 = vmul.f32 %v591_v9, %v915_v49  ;;  %s753_s6 = sld [smem:[#allocation2 + $0x24]] }
  0x40   :  { %v585_v13 = vrot.slane %v583_v8, 1  ;;  %v372_v14 = vmul.f32 %v371_v10, %v915_v49  ;;  %v387_v15 = vstv %s752_s27  ;;  %s755_s7 = sld [smem:[#allocation2 + $0x46]] }
  0x41   :  { %110 = vrot.lane.b32.xlu1 %v109_v43, %s842_s8  ;;  %v167_v16 = vstv %s723_s28  ;;  %v594_v17 = vrot.slane %v592_v12, 1  ;;  %v388_v18 = vmul.f32 %v387_v15, %v915_v49  ;;  %s726_s9 = sld [smem:[#allocation2 + $0x3d]] }
  0x42   :  { %541 = vrot.lane.b32.xlu0 %v540_v45, %s841_s4  ;;  %v374_v19 = vrot.slane %v372_v14, 1  ;;  %v168_v20 = vmul.f32 %v167_v16, %v915_v49  ;;  %v176_v21 = vstv %s724_s29  ;;  %s727_s10 = sld [smem:[#allocation2 + $0x3c]] }
  0x43   :  { %v607_v22 = vstv %s782_s30  ;;  %v390_v23 = vrot.slane %v388_v18, 2  ;;  %v177_v24 = vmul.f32 %v176_v21, %v915_v49  ;;  %s785_s11 = sld [smem:[#allocation2 + $0x4f]] }
  0x44   :  { %v170_v25 = vrot.slane %v168_v20, 2  ;;  %v608_v26 = vmul.f32 %v607_v22, %v915_v49  ;;  %v616_v27 = vstv %s783_s5  ;;  %s953_s12 = sld [smem:[#allocation2 + $0x4e]] }
  0x45   :  { %550 = vrot.lane.b32.xlu1 %v549_v47, %s842_s8  ;;  %v396_v28 = vstv %s753_s6  ;;  %v179_v29 = vrot.slane %v177_v24, 2  ;;  %v617_v30 = vmul.f32 %v616_v27, %v915_v49  ;;  %s956_s13 = sld [smem:[#allocation2 + $0x45]] }
  0x46   :  { %330 = vrot.lane.b32.xlu0 %v329_v48, %s842_s8  ;;  %v610_v31 = vrot.slane %v608_v26, 2  ;;  %v397_v32 = vmul.f32 %v396_v28, %v915_v49  ;;  %v409_v36 = vstv %s755_s7  ;;  %s758_s16 = sld [smem:[#allocation2 + $0x43]] }
  0x47   :  { %v619_v33 = vrot.slane %v617_v30, 2  ;;  %v189_v37 = vstv %s726_s9  ;;  %s729_s17 = sld [smem:[#allocation2 + $0x3a]]  ;;  %v410_v38 = vmul.f32 %v409_v36, %v962_v35 }
  0x48   :  { %v399_v34 = vrot.slane %v397_v32, 2  ;;  %v190_v39 = vmul.f32 %v189_v37, %v962_v35  ;;  %v197_v40 = vstv %s727_s10  ;;  %s730_s18 = sld [smem:[#allocation2 + $0x39]] }
  0x49   :  { %342 = vrot.lane.b32.xlu1 %v340_v52, %s841_s4  ;;  %v629_v41 = vstv %s785_s11  ;;  %s788_s19 = sld [smem:[#allocation2 + $0x4c]]  ;;  %v198_v42 = vmul.f32 %v197_v40, %v962_v35 }
  0x4a   :  { %122 = vrot.lane.b32.xlu0 %v120_v53, %s841_s4  ;;  %v630_v43 = vmul.f32 %v629_v41, %v962_v35  ;;  %v637_v44 = vstv %s953_s12  ;;  %s789_s2 = sld [smem:[#allocation2 + $0x4b]] }
  0x4b   :  { %v417_v46 = vstv %s956_s13  ;;  %s759_s20 = sld [smem:[#allocation2 + $0x42]]  ;;  %v638_v48 = vmul.f32 %v637_v44, %v962_v35 }
  0x4c   :  { %v432_v45 = vstv %s758_s16  ;;  %v418_v51 = vmul.f32 %v417_v46, %v962_v35  ;;  %s761_s0 = sld [smem:[#allocation2 + $0x40]] }
  0x4d   :  { %130 = vrot.lane.b32.xlu1 %v128_v56, %s842_s8  ;;  %v212_v47 = vstv %s729_s17  ;;  %v433_v50 = vmul.f32 %v432_v45, %v962_v35  ;;  %s732_s1 = sld [smem:[#allocation2 + $0x37]] }
  0x4e   :  { %562 = vrot.lane.b32.xlu0 %v560_v57, %s841_s4  ;;  %v213_v52 = vmul.f32 %v212_v47, %v962_v35  ;;  %v221_v53 = vstv %s730_s18  ;;  %s733_s21 = sld [smem:[#allocation2 + $0x36]] }
  0x4f   :  { %v652_v54 = vstv %s788_s19  ;;  %v435_v55 = vrot.slane %v433_v50, 1  ;;  %v222_v56 = vmul.f32 %v221_v53, %v962_v35  ;;  %s791_s22 = sld [smem:[#allocation2 + $0x49]] }
  0x50   :  { %v215_v57 = vrot.slane %v213_v52, 1  ;;  %v653_v58 = vmul.f32 %v652_v54, %v962_v35  ;;  %v661_v59 = vstv %s789_s2  ;;  %s792_s23 = sld [smem:[#allocation2 + $0x48]] }
  0x51   :  { %570 = vrot.lane.b32.xlu1 %v568_v62, %s842_s8  ;;  %v441_v60 = vstv %s759_s20  ;;  %v224_v61 = vrot.slane %v222_v56, 1  ;;  %v662_v62 = vmul.f32 %v661_v59, %v962_v35  ;;  %s762_s24 = sld [smem:[#allocation2 + $0x3f]] }
  0x52   :  { %350 = vrot.lane.b32.xlu0 %v348_v1, %s842_s8  ;;  %v655_v63 = vrot.slane %v653_v58, 1  ;;  %v442_v1 = vmul.f32 %v441_v60, %v962_v35  ;;  %v457_v2 = vstv %s761_s0  ;;  %s736_s25 = sld [smem:[#allocation2 + $0x11]] }
  0x53   :  { %v237_v3 = vstv %s732_s1  ;;  %v664_v4 = vrot.slane %v662_v62, 1  ;;  %s735_s26 = sld [smem:[#allocation4 + $0x1]] }
  0x54   :  { %v444_v6 = vrot.slane %v442_v1, 1  ;;  %v246_v8 = vstv %s733_s21  ;;  %s708_s27 = sld [smem:[#allocation2 + $0x8]] }
  0x55   :  { %366 = vrot.lane.b32.xlu1 %v365_v5, %s841_s4  ;;  %v458_v5 = vmul.f32 %v457_v2, %v962_v35  ;;  %v677_v9 = vstv %s791_s22  ;;  %s739_s28 = sld [smem:[#allocation2 + $0xe]] }
  0x56   :  { %146 = vrot.lane.b32.xlu0 %v145_v7, %s841_s4  ;;  %v238_v7 = vmul.f32 %v237_v3, %v962_v35  ;;  %v686_v14 = vstv %s792_s23  ;;  %s766_s29 = sld [smem:[#allocation2 + $0x1a]] }
  0x57   :  { %v460_v10 = vrot.slane %v458_v5, 2  ;;  %v466_v15 = vstv %s762_s24  ;;  %s42_s30 = sld [smem:[#allocation4]] }
  0x58   :  { %v240_v12 = vrot.slane %v238_v7, 2  ;;  %v265_v26 = vstv %s736_s25  ;;  %s765_s5 = sld [smem:[#allocation4 + $0x2]] }
  0x59   :  { %155 = vrot.lane.b32.xlu1 %v154_v11, %s842_s8  ;;  %v247_v11 = vmul.f32 %v246_v8, %v962_v35  ;;  %v263_v30 = vstv %s735_s26  ;;  %s742_s6 = sld [smem:[#allocation2 + $0xb]] }
  0x5a   :  { %586 = vrot.lane.b32.xlu0 %v585_v13, %s841_s4  ;;  %v678_v13 = vmul.f32 %v677_v9, %v962_v35  ;;  %s714_s7 = sld [smem:[#allocation2 + $0x2]] }
  0x5b   :  { %v249_v16 = vrot.slane %v247_v11, 2  ;;  %s772_s9 = sld [smem:[#allocation2 + $0x14]] }
  0x5c   :  { %v680_v18 = vrot.slane %v678_v13, 2  ;;  %s745_s10 = sld [smem:[#allocation2 + $0x2c]] }
  0x5d   :  { %595 = vrot.lane.b32.xlu1 %v594_v17, %s842_s8  ;;  %v687_v17 = vmul.f32 %v686_v14, %v962_v35  ;;  %s716_s11 = sld [smem:[#allocation2 + $0x23]] }
  0x5e   :  { %375 = vrot.lane.b32.xlu0 %v374_v19, %s842_s8  ;;  %v467_v19 = vmul.f32 %v466_v15, %v962_v35  ;;  %v483_v47 = vstv %s765_s5  ;;  %s1013_s12 = sld [smem:[#allocation2 + $0x35]] }
  0x5f   :  { %v689_v20 = vrot.slane %v687_v17, 2  ;;  %s1015_s13 = sld [smem:[#allocation2 + $0x20]] }
  0x60   :  { %v469_v21 = vrot.slane %v467_v19, 2  ;;  %v90_v2 = vstv %s714_s7  ;;  %s1017_s14 = sld [smem:[#allocation2 + $0x29]] }
  0x61   :  { %391 = vrot.lane.b32.xlu1 %v390_v23, %s841_s4  ;;  %v91_v9 = vmul.f32 %v90_v2, %v872_v0  ;;  %v530_v13 = vstv %s772_s9  ;;  %s1019_s15 = sld [smem:[#allocation2 + $0x32]] }
  0x62   :  { %171 = vrot.lane.b32.xlu0 %v170_v25, %s841_s4  ;;  %v531_v19 = vmul.f32 %v530_v13, %v872_v0  ;;  %s1025_s16 = sld [smem:[#allocation2 + $0x1d]] }
  0x63   :  { %s1028_s17 = sld [smem:[#allocation2 + $0x26]] }
  0x64   :  { %s1034_s18 = sld [smem:[#allocation2 + $0x2f]] }
  0x65   :  { %180 = vrot.lane.b32.xlu1 %v179_v29, %s842_s8  ;;  %v266_v29 = vmul.f32 %v265_v26, %v872_v0  ;;  %v533_v26 = vrot.slane %v531_v19, 2  ;;  %s725_s19 = sld [smem:[#allocation2 + $0x3e]] }
  0x66   :  { %611 = vrot.lane.b32.xlu0 %v610_v31, %s841_s4  ;;  %v45_v31 = vstv %s708_s27  ;;  %s1042_s2 = sld [smem:[#allocation2 + $0x50]] }
  0x67   :  { %v267_v36 = vadd.f32 %v266_v29, %v263_v30  ;;  %v46_v37 = vmul.f32 %v45_v31, %v872_v0  ;;  %s754_s20 = sld [smem:[#allocation2 + $0x47]] }
  0x68   :  { %s728_s0 = sld [smem:[#allocation2 + $0x3b]] }
  0x69   :  { %620 = vrot.lane.b32.xlu1 %v619_v33, %s842_s8  ;;  %v285_v33 = vstv %s739_s28  ;;  %s787_s1 = sld [smem:[#allocation2 + $0x4d]] }
  0x6a   :  { %400 = vrot.lane.b32.xlu0 %v399_v34, %s842_s8  ;;  %v286_v40 = vmul.f32 %v285_v33, %v872_v0  ;;  %s757_s21 = sld [smem:[#allocation2 + $0x44]] }
  0x6b   :  { %s731_s22 = sld [smem:[#allocation2 + $0x38]] }
  0x6c   :  { %v288_v50 = vrot.slane %v286_v40, 1  ;;  %v135_v40 = vstv %s1015_s13  ;;  %s790_s23 = sld [smem:[#allocation2 + $0x4a]] }
  0x6d   :  { %412 = vrot.lane.b32.xlu1 %v410_v38, %s841_s4  ;;  %v485_v38 = vstv %s766_s29  ;;  %s760_s24 = sld [smem:[#allocation2 + $0x41]] }
  0x6e   :  { %192 = vrot.lane.b32.xlu0 %v190_v39, %s841_s4  ;;  %v43_v39 = vstv %s42_s30  ;;  %v486_v45 = vmul.f32 %v485_v38, %v872_v0 }
  0x6f   :  { %v47_v46 = vadd.f32 %v46_v37, %v43_v39  ;;  %v555_v39 = vstv %s1013_s12 }
  0x71   :  { %200 = vrot.lane.b32.xlu1 %v198_v42, %s842_s8 }
  0x72   :  { %632 = vrot.lane.b32.xlu0 %v630_v43, %s841_s4 }
  0x75   :  { %640 = vrot.lane.b32.xlu1 %v638_v48, %s842_s8 }
  0x76   :  { %420 = vrot.lane.b32.xlu0 %v418_v51, %s842_s8 }
  0x79   :  { %436 = vrot.lane.b32.xlu1 %v435_v55, %s841_s4  ;;  %v487_v55 = vadd.f32 %v486_v45, %v483_v47  ;;  %v556_v47 = vmul.f32 %v555_v39, %v915_v49 }
  0x7a   :  { %216 = vrot.lane.b32.xlu0 %v215_v57, %s841_s4  ;;  %v310_v57 = vstv %s742_s6 }
  0x7b   :  { %v311_v1 = vmul.f32 %v310_v57, %v872_v0 }
  0x7d   :  { %225 = vrot.lane.b32.xlu1 %v224_v61, %s842_s8 }
  0x7e   :  { %656 = vrot.lane.b32.xlu0 %v655_v63, %s841_s4 }
  0x81   :  { %665 = vrot.lane.b32.xlu1 %v664_v4, %s842_s8 }
  0x82   :  { %445 = vrot.lane.b32.xlu0 %v444_v6, %s842_s8 }
  0x85   :  { %461 = vrot.lane.b32.xlu1 %v460_v10, %s841_s4 }
  0x86   :  { %241 = vrot.lane.b32.xlu0 %v240_v12, %s841_s4  ;;  %v313_v12 = vrot.slane %v311_v1, 2 }
  0x89   :  { %250 = vrot.lane.b32.xlu1 %v249_v16, %s842_s8 }
  0x8a   :  { %681 = vrot.lane.b32.xlu0 %v680_v18, %s841_s4  ;;  %s711_s4 = sld [smem:[#allocation2 + $0x5]]  ;;  %v93_v18 = vrot.slane %v91_v9, 2 }
  0x8d   :  { %690 = vrot.lane.b32.xlu1 %v689_v20, %s842_s8 }
  0x8e   :  { %470 = vrot.lane.b32.xlu0 %v469_v21, %s842_s8  ;;  %s769_s8 = sld [smem:[#allocation2 + $0x17]] }
  0x90   :  { %v65_v44 = vstv %s711_s4 }
  0x91   :  { %v66_v52 = vmul.f32 %v65_v44, %v872_v0 }
  0x93   :  { %v68_v61 = vrot.slane %v66_v52, 1  ;;  %v575_v52 = vstv %s1019_s15 }
  0x94   :  { %v505_v54 = vstv %s769_s8 }
  0x95   :  { %v506_v62 = vmul.f32 %v505_v54, %v872_v0  ;;  %v115_v0 = vstv %s716_s11 }
  0x96   :  { %v116_v37 = vmul.f32 %v115_v0, %v915_v49 }
  0x97   :  { %v493_v22 = vpop.permute.xlu1 %492  ;;  %v508_v8 = vrot.slane %v506_v62, 1 }
  0x98   :  { %v53_v23 = vpop.permute.xlu0 %52  ;;  %v495_v3 = vadd.f32 %v493_v22, %v487_v55 }
  0x99   :  { %v55_v56 = vadd.f32 %v53_v23, %v47_v46 }
  0x9b   :  { %v61_v24 = vpop.permute.xlu1 %60 }
  0x9c   :  { %v273_v25 = vpop.permute.xlu0 %272  ;;  %v63_v60 = vadd.f32 %v61_v24, %v55_v56 }
  0x9d   :  { %v275_v43 = vadd.f32 %v273_v25, %v267_v36 }
  0x9e   :  { %v70_v7 = vadd.f32 %v68_v61, %v63_v60  ;;  %v576_v60 = vmul.f32 %v575_v52, %v915_v49  ;;  %v645_v52 = vstv %s787_s1 }
  0x9f   :  { %v501_v27 = vpop.permute.xlu1 %500 }
  0xa0   :  { %v281_v28 = vpop.permute.xlu0 %280  ;;  %v503_v6 = vadd.f32 %v501_v27, %v495_v3  ;;  %v335_v27 = vstv %s745_s10  ;;  %v380_v3 = vstv %s1028_s17 }
  0xa1   :  { %v283_v48 = vadd.f32 %v281_v28, %v275_v43  ;;  %v381_v13 = vmul.f32 %v380_v3, %v915_v49 }
  0xa2   :  { %v510_v17 = vadd.f32 %v508_v8, %v503_v6  ;;  %v578_v6 = vrot.slane %v576_v60, 1 }
  0xa3   :  { %v297_v32 = vpop.permute.xlu1 %296  ;;  %v290_v58 = vadd.f32 %v288_v50, %v283_v48  ;;  %v136_v50 = vmul.f32 %v135_v40, %v915_v49 }
  0xa4   :  { %v77_v34 = vpop.permute.xlu0 %76 }
  0xa5   :  { %v299_v4 = vadd.f32 %v297_v32, %v290_v58  ;;  %v79_v14 = vadd.f32 %v77_v34, %v70_v7  ;;  %v336_v32 = vmul.f32 %v335_v27, %v915_v49  ;;  %v138_v58 = vrot.slane %v136_v50, 1 }
  0xa7   :  { %v86_v41 = vpop.permute.xlu1 %85 }
  0xa8   :  { %v517_v42 = vpop.permute.xlu0 %516  ;;  %v88_v16 = vadd.f32 %v86_v41, %v79_v14 }
  0xa9   :  { %v519_v22 = vadd.f32 %v517_v42, %v510_v17  ;;  %v355_v42 = vstv %s1017_s14 }
  0xaa   :  { %v95_v25 = vadd.f32 %v93_v18, %v88_v16 }
  0xab   :  { %v526_v51 = vpop.permute.xlu1 %525 }
  0xac   :  { %v306_v53 = vpop.permute.xlu0 %305  ;;  %v528_v24 = vadd.f32 %v526_v51, %v519_v22  ;;  %v356_v51 = vmul.f32 %v355_v42, %v915_v49  ;;  %v383_v22 = vrot.slane %v381_v13, 2  ;;  %v670_v13 = vstv %s790_s23 }
  0xad   :  { %v308_v11 = vadd.f32 %v306_v53, %v299_v4 }
  0xae   :  { %v535_v36 = vadd.f32 %v533_v26, %v528_v24  ;;  %v358_v62 = vrot.slane %v356_v51, 1  ;;  %v185_v24 = vstv %s725_s19 }
  0xaf   :  { %v322_v59 = vpop.permute.xlu1 %321  ;;  %v315_v21 = vadd.f32 %v313_v12, %v308_v11  ;;  %v186_v0 = vmul.f32 %v185_v24, %v962_v35 }
  0xb0   :  { %v102_v63 = vpop.permute.xlu0 %101 }
  0xb1   :  { %v324_v29 = vadd.f32 %v322_v59, %v315_v21  ;;  %v104_v30 = vadd.f32 %v102_v63, %v95_v25  ;;  %v160_v63 = vstv %s1025_s16 }
  0xb2   :  { %v161_v8 = vmul.f32 %v160_v63, %v915_v49 }
  0xb3   :  { %v111_v5 = vpop.permute.xlu1 %110 }
  0xb4   :  { %v542_v10 = vpop.permute.xlu0 %541  ;;  %v113_v34 = vadd.f32 %v111_v5, %v104_v30  ;;  %v163_v17 = vrot.slane %v161_v8, 2 }
  0xb5   :  { %v544_v41 = vadd.f32 %v542_v10, %v535_v36  ;;  %v600_v10 = vstv %s1034_s18  ;;  %v405_v36 = vstv %s754_s20 }
  0xb6   :  { %v117_v46 = vadd.f32 %v116_v37, %v113_v34  ;;  %v601_v18 = vmul.f32 %v600_v10, %v915_v49  ;;  %v406_v42 = vmul.f32 %v405_v36, %v962_v35 }
  0xb7   :  { %v551_v15 = vpop.permute.xlu1 %550 }
  0xb8   :  { %v331_v20 = vpop.permute.xlu0 %330  ;;  %v553_v45 = vadd.f32 %v551_v15, %v544_v41 }
  0xb9   :  { %v333_v31 = vadd.f32 %v331_v20, %v324_v29 }
  0xba   :  { %v557_v57 = vadd.f32 %v556_v47, %v553_v45 }
  0xbb   :  { %v343_v23 = vpop.permute.xlu1 %342  ;;  %v337_v43 = vadd.f32 %v336_v32, %v333_v31  ;;  %v625_v32 = vstv %s1042_s2 }
  0xbc   :  { %v123_v28 = vpop.permute.xlu0 %122  ;;  %v626_v39 = vmul.f32 %v625_v32, %v962_v35 }
  0xbd   :  { %v125_v53 = vadd.f32 %v123_v28, %v117_v46  ;;  %v345_v54 = vadd.f32 %v343_v23, %v337_v43  ;;  %v603_v28 = vrot.slane %v601_v18, 2  ;;  %v205_v43 = vstv %s728_s0 }
  0xbe   :  { %v671_v18 = vmul.f32 %v670_v13, %v962_v35 }
  0xbf   :  { %v131_v33 = vpop.permute.xlu1 %130 }
  0xc0   :  { %v563_v38 = vpop.permute.xlu0 %562  ;;  %v133_v56 = vadd.f32 %v131_v33, %v125_v53 }
  0xc1   :  { %v565_v1 = vadd.f32 %v563_v38, %v557_v57  ;;  %v646_v57 = vmul.f32 %v645_v52, %v962_v35 }
  0xc2   :  { %v140_v5 = vadd.f32 %v138_v58, %v133_v56 }
  0xc3   :  { %v571_v44 = vpop.permute.xlu1 %570 }
  0xc4   :  { %v351_v48 = vpop.permute.xlu0 %350  ;;  %v573_v4 = vadd.f32 %v571_v44, %v565_v1  ;;  %v648_v1 = vrot.slane %v646_v57, 1 }
  0xc5   :  { %v353_v61 = vadd.f32 %v351_v48, %v345_v54  ;;  %v206_v48 = vmul.f32 %v205_v43, %v962_v35  ;;  %v425_v54 = vstv %s757_s21 }
  0xc6   :  { %v580_v15 = vadd.f32 %v578_v6, %v573_v4 }
  0xc7   :  { %v367_v55 = vpop.permute.xlu1 %366  ;;  %v360_v9 = vadd.f32 %v358_v62, %v353_v61  ;;  %v208_v56 = vrot.slane %v206_v48, 1 }
  0xc8   :  { %v147_v59 = vpop.permute.xlu0 %146 }
  0xc9   :  { %v149_v11 = vadd.f32 %v147_v59, %v140_v5  ;;  %v369_v19 = vadd.f32 %v367_v55, %v360_v9  ;;  %v426_v59 = vmul.f32 %v425_v54, %v962_v35  ;;  %v230_v5 = vstv %s731_s22 }
  0xca   :  { %v231_v10 = vmul.f32 %v230_v5, %v962_v35 }
  0xcb   :  { %v156_v2 = vpop.permute.xlu1 %155  ;;  %v428_v4 = vrot.slane %v426_v59, 1 }
  0xcc   :  { %v587_v7 = vpop.permute.xlu0 %586  ;;  %v158_v14 = vadd.f32 %v156_v2, %v149_v11 }
  0xcd   :  { %v589_v20 = vadd.f32 %v587_v7, %v580_v15  ;;  %v450_v15 = vstv %s760_s24 }
  0xce   :  { %v165_v27 = vadd.f32 %v163_v17, %v158_v14  ;;  %v233_v17 = vrot.slane %v231_v10, 2 }
  0xcf   :  { %v596_v12 = vpop.permute.xlu1 %595 }
  0xd0   :  { %v376_v16 = vpop.permute.xlu0 %375  ;;  %v598_v25 = vadd.f32 %v596_v12, %v589_v20  ;;  %v451_v20 = vmul.f32 %v450_v15, %v962_v35 }
  0xd1   :  { %v378_v21 = vadd.f32 %v376_v16, %v369_v19 }
  0xd2   :  { %v605_v33 = vadd.f32 %v603_v28, %v598_v25  ;;  %v673_v25 = vrot.slane %v671_v18, 2  ;;  %v453_v28 = vrot.slane %v451_v20, 2 }
  0xd3   :  { %v392_v23 = vpop.permute.xlu1 %391  ;;  %v385_v30 = vadd.f32 %v383_v22, %v378_v21 }
  0xd4   :  { %v172_v26 = vpop.permute.xlu0 %171 }
  0xd5   :  { %v174_v29 = vadd.f32 %v172_v26, %v165_v27  ;;  %v394_v40 = vadd.f32 %v392_v23, %v385_v30 }
  0xd7   :  { %v181_v31 = vpop.permute.xlu1 %180 }
  0xd8   :  { %v183_v49 = vadd.f32 %v181_v31, %v174_v29  ;;  %v612_v34 = vpop.permute.xlu0 %611 }
  0xd9   :  { %v614_v37 = vadd.f32 %v612_v34, %v605_v33 }
  0xda   :  { %v187_v38 = vadd.f32 %v186_v0, %v183_v49 }
  0xdb   :  { %v621_v41 = vpop.permute.xlu1 %620 }
  0xdc   :  { %v623_v44 = vadd.f32 %v621_v41, %v614_v37  ;;  %v401_v45 = vpop.permute.xlu0 %400 }
  0xdd   :  { %v403_v46 = vadd.f32 %v401_v45, %v394_v40 }
  0xde   :  { %v627_v47 = vadd.f32 %v626_v39, %v623_v44 }
  0xdf   :  { %v413_v50 = vpop.permute.xlu1 %412  ;;  %v407_v51 = vadd.f32 %v406_v42, %v403_v46 }
  0xe0   :  { %v193_v53 = vpop.permute.xlu0 %192 }
  0xe1   :  { %v195_v55 = vadd.f32 %v193_v53, %v187_v38  ;;  %v415_v2 = vadd.f32 %v413_v50, %v407_v51 }
  0xe3   :  { %v201_v58 = vpop.permute.xlu1 %200 }
  0xe4   :  { %v203_v60 = vadd.f32 %v201_v58, %v195_v55  ;;  %v633_v61 = vpop.permute.xlu0 %632 }
  0xe5   :  { %v635_v62 = vadd.f32 %v633_v61, %v627_v47 }
  0xe6   :  { %v210_v63 = vadd.f32 %v208_v56, %v203_v60 }
  0xe7   :  { %v641_v3 = vpop.permute.xlu1 %640 }
  0xe8   :  { %v643_v6 = vadd.f32 %v641_v3, %v635_v62  ;;  %v421_v7 = vpop.permute.xlu0 %420 }
  0xe9   :  { %v423_v8 = vadd.f32 %v421_v7, %v415_v2 }
  0xea   :  { %v650_v9 = vadd.f32 %v648_v1, %v643_v6 }
  0xeb   :  { %v437_v11 = vpop.permute.xlu1 %436  ;;  %v430_v12 = vadd.f32 %v428_v4, %v423_v8 }
  0xec   :  { %v217_v14 = vpop.permute.xlu0 %216 }
  0xed   :  { %v219_v16 = vadd.f32 %v217_v14, %v210_v63  ;;  %v439_v26 = vadd.f32 %v437_v11, %v430_v12 }
  0xef   :  { %v226_v19 = vpop.permute.xlu1 %225 }
  0xf0   :  { %v228_v21 = vadd.f32 %v226_v19, %v219_v16  ;;  %v657_v22 = vpop.permute.xlu0 %656 }
  0xf1   :  { %v659_v23 = vadd.f32 %v657_v22, %v650_v9 }
  0xf2   :  { %v235_v24 = vadd.f32 %v233_v17, %v228_v21 }
  0xf3   :  { %v666_v27 = vpop.permute.xlu1 %665 }
  0xf4   :  { %v668_v29 = vadd.f32 %v666_v27, %v659_v23  ;;  %v446_v0 = vpop.permute.xlu0 %445 }
  0xf5   :  { %v448_v30 = vadd.f32 %v446_v0, %v439_v26 }
  0xf6   :  { %v675_v31 = vadd.f32 %v673_v25, %v668_v29 }
  0xf7   :  { %v462_v32 = vpop.permute.xlu1 %461  ;;  %v455_v49 = vadd.f32 %v453_v28, %v448_v30 }
  0xf8   :  { %v242_v33 = vpop.permute.xlu0 %241 }
  0xf9   :  { %v244_v34 = vadd.f32 %v242_v33, %v235_v24  ;;  %v464_v40 = vadd.f32 %v462_v32, %v455_v49 }
  0xfb   :  { %v251_v36 = vpop.permute.xlu1 %250 }
  0xfc   :  { %v253_v37 = vadd.f32 %v251_v36, %v244_v34  ;;  %v682_v38 = vpop.permute.xlu0 %681 }
  0xfd   :  { %v684_v39 = vadd.f32 %v682_v38, %v675_v31 }
  0xfe   :  { %v734_v35 = vmul.f32 -1.442695, %v253_v37 }
  0xff   :  { %v691_v41 = vpop.permute.xlu1 %690 }
 0x100   :  { %799 = vpow2.f32 %v734_v35  ;;  %v693_v42 = vadd.f32 %v691_v41, %v684_v39  ;;  %v471_v43 = vpop.permute.xlu0 %470 }
 0x101   :  { %v473_v44 = vadd.f32 %v471_v43, %v464_v40 }
 0x102   :  { %v793_v45 = vmul.f32 -1.442695, %v693_v42 }
 0x103   :  { %v763_v46 = vmul.f32 -1.442695, %v473_v44 }
 0x104   :  { %801 = vpow2.f32 %v793_v45 }
 0x105   :  { %803 = vpow2.f32 %v763_v46 }
 0x10d   :  { %v800_v47 = vpop.eup %799 }
 0x10e   :  { %v257_v48 = vadd.f32 1.0, %v800_v47 }
 0x110   :  { %805 = vrcp.f32 %v257_v48 }
 0x111   :  { %v802_v50 = vpop.eup %801 }
 0x112   :  { %v804_v51 = vpop.eup %803  ;;  %v697_v52 = vadd.f32 1.0, %v802_v50 }
 0x113   :  { %v477_v53 = vadd.f32 1.0, %v804_v51 }
 0x114   :  { %807 = vrcp.f32 %v697_v52 }
 0x115   :  { %809 = vrcp.f32 %v477_v53 }
 0x11d   :  { %v806_v54 = vpop.eup %805 }
 0x11e   :  { %261 = vst.msk [vmem:[%s1067_s3] sm:$0x1f] %vm260_vm0, %v806_v54 }
 0x121   :  { %v808_v55 = vpop.eup %807 }
 0x122   :  { %v810_v56 = vpop.eup %809  ;;  %794 = vst.msk [vmem:[%s1067_s3 + $0x10] sm:$0x1f] %vm260_vm0, %v808_v55 }
 0x123   :  { %764 = vst.msk [vmem:[%s1067_s3 + $0x8] sm:$0x1f] %vm260_vm0, %v810_v56 }
 0x124   :  { %706 = vsyncpa [#allocation3], 1 }
 0x125   :  { %707 = vsyncpa [#allocation5], 1 }

</bundles_post_ra>
